<compile_context>
chip_gen: v7x
topology: tpu7x:2x2x1
jax: 0.10.0
libtpu: 0.0.40
codegen_flags: <defaults>
</compile_context>

<pallas_src>
import functools

import jax
import jax.numpy as jnp
from jax.experimental import pallas as pl
from jax.experimental.pallas import tpu as pltpu


# ---------------------------------------------------------------------------
# Fused kernel: one batch element per grid step.
# ---------------------------------------------------------------------------
def _fused_attention_kernel(scale, x_ref, wq_ref, wk_ref, wv_ref, wp_ref,
                            b_ref, o_ref):
    """qkv projection -> per-head softmax attention -> output proj + bias."""
    H = wq_ref.shape[0]
    N = x_ref.shape[1]
    C = x_ref.shape[2]

    x = x_ref[0]                                    # (N, C)
    acc = jnp.zeros((N, C), jnp.float32)

    # Heads are tiny (head_dim = 3): static unrolled loop, everything in vregs.
    for h in range(H):
        q_h = jnp.dot(x, wq_ref[h], preferred_element_type=jnp.float32) * scale
        k_h = jnp.dot(x, wk_ref[h], preferred_element_type=jnp.float32)
        v_h = jnp.dot(x, wv_ref[h], preferred_element_type=jnp.float32)

        # scores = q_h @ k_h^T without materializing a transpose.
        s = jax.lax.dot_general(
            q_h, k_h, (((1,), (1,)), ((), ())),
            preferred_element_type=jnp.float32)     # (N, N)

        # softmax along the last axis (max-subtracted, EUP reciprocal).
        m = jnp.max(s, axis=-1, keepdims=True)
        e = jnp.exp(s - m)
        p = e * pl.reciprocal(jnp.sum(e, axis=-1, keepdims=True), approx=True)

        ctx = jnp.dot(p, v_h, preferred_element_type=jnp.float32)     # (N, d)
        # Fused output projection: accumulate ctx @ w_proj[h*d:(h+1)*d, :].
        acc = acc + jnp.dot(ctx, wp_ref[h], preferred_element_type=jnp.float32)

    o_ref[0] = acc + b_ref[...]                     # (1, C) broadcast -> (N, C)


# ---------------------------------------------------------------------------
# Wrapper: prepares per-head weight views (pure JAX on tiny tensors) and calls
# a single pallas_call over a per-batch grid.
# ---------------------------------------------------------------------------
def attention1_forward(x, w_qkv, w_proj, b_proj, num_heads, scale):
    """x: (B, N, C); w_qkv: (C, 3*18); w_proj: (18, C); b_proj: (C,)."""
    B, N, C = x.shape
    inner = w_proj.shape[0]                 # 18
    H = num_heads
    d = inner // H
    assert inner % H == 0 and w_qkv.shape == (C, 3 * inner)

    # PyTorch reshape order of the qkv output columns is (3, H, d).
    w = w_qkv.reshape(C, 3, H, d).transpose(1, 2, 0, 3)   # (3, H, C, d)
    wq, wk, wv = w[0], w[1], w[2]                         # (H, C, d)
    wp = w_proj.reshape(H, d, C)                          # (H, d, C)
    b2 = b_proj.reshape(1, C)

    kernel = functools.partial(_fused_attention_kernel, scale)
    return pl.pallas_call(
        kernel,
        out_shape=jax.ShapeDtypeStruct((B, N, C), jnp.float32),
        grid=(B,),
        in_specs=[
            pl.BlockSpec((1, N, C), lambda b: (b, 0, 0)),   # x (one batch row)
            pl.BlockSpec((H, C, d), lambda b: (0, 0, 0)),   # wq (VMEM-resident)
            pl.BlockSpec((H, C, d), lambda b: (0, 0, 0)),   # wk
            pl.BlockSpec((H, C, d), lambda b: (0, 0, 0)),   # wv
            pl.BlockSpec((H, d, C), lambda b: (0, 0, 0)),   # w_proj per head
            pl.BlockSpec((1, C), lambda b: (0, 0)),         # proj bias
        ],
        out_specs=pl.BlockSpec((1, N, C), lambda b: (b, 0, 0)),
        compiler_params=pltpu.CompilerParams(
            dimension_semantics=("parallel",)),             # v7x: use both TCs
    )(x, wq, wk, wv, wp, b2)


# ---------------------------------------------------------------------------
# Pure-JAX reference mirroring the PyTorch forward (dropout p=0 omitted).
# ---------------------------------------------------------------------------
def reference(x, w_qkv, w_proj, b_proj, num_heads, scale):
    B, N, C = x.shape
    inner = w_proj.shape[0]
    H = num_heads
    d = inner // H
    qkv = (x @ w_qkv).reshape(B, N, 3, H, d).transpose(2, 0, 3, 1, 4)
    q, k, v = qkv[0], qkv[1], qkv[2]
    attn = jax.nn.softmax((q @ jnp.swapaxes(k, -2, -1)) * scale, axis=-1)
    ctx = jnp.swapaxes(attn @ v, 1, 2).reshape(B, N, inner)
    return ctx @ w_proj + b_proj


if __name__ == "__main__":
    # Small shapes consistent with the module: inner attention width is fixed
    # at 18, so num_heads must divide 18 -> use 6 (head_dim = 3).
    B, N, dim, H = 2, 16, 32, 6
    inner = 18
    scale = 18 ** (-0.5)      # qk_scale default in the module

    key = jax.random.PRNGKey(0)
    k1, k2, k3, k4 = jax.random.split(key, 4)
    x = jax.random.normal(k1, (B, N, dim), jnp.float32)
    w_qkv = jax.random.normal(k2, (dim, 3 * inner), jnp.float32) * 0.05
    w_proj = jax.random.normal(k3, (inner, dim), jnp.float32) * 0.05
    b_proj = jax.random.normal(k4, (dim,), jnp.float32) * 0.05

    run = jax.jit(functools.partial(attention1_forward,
                                    num_heads=H, scale=scale))
    out = run(x, w_qkv, w_proj, b_proj)
    out = jax.block_until_ready(out)

    ref = reference(x, w_qkv, w_proj, b_proj, H, scale)
    assert out.shape == (B, N, dim)
    max_err = float(jnp.max(jnp.abs(out - ref)))
    # Slightly loose tolerance because the in-kernel softmax uses the EUP
    # approximate reciprocal (per performance review).
    assert max_err < 2e-3, f"mismatch vs reference: max_err={max_err}"

    print("KERNEL_OK")
</pallas_src>

<mosaic_0001>
module attributes {stable_mosaic.version = 11 : i64} {
  func.func @_fused_attention_kernel(%arg0: i32, %arg1: memref<1x16x32xf32, #tpu.memory_space<vmem>>, %arg2: memref<6x32x3xf32, #tpu.memory_space<vmem>>, %arg3: memref<6x32x3xf32, #tpu.memory_space<vmem>>, %arg4: memref<6x32x3xf32, #tpu.memory_space<vmem>>, %arg5: memref<6x3x32xf32, #tpu.memory_space<vmem>>, %arg6: memref<1x32xf32, #tpu.memory_space<vmem>>, %arg7: memref<1x16x32xf32, #tpu.memory_space<vmem>>) attributes {dimension_semantics = [#tpu.dimension_semantics<parallel>], iteration_bounds = array<i64: 2>, scalar_prefetch = 0 : i64, scratch_operands = 0 : i64, tpu.core_type = #tpu.core_type<tc>, window_params = [{transform_indices = @transform_0, window_bounds = array<i64: 1, 16, 32>}, {pipeline_mode = #tpu.pipeline_mode<synchronous>, transform_indices = @transform_1, window_bounds = array<i64: 6, 32, 3>}, {pipeline_mode = #tpu.pipeline_mode<synchronous>, transform_indices = @transform_2, window_bounds = array<i64: 6, 32, 3>}, {pipeline_mode = #tpu.pipeline_mode<synchronous>, transform_indices = @transform_3, window_bounds = array<i64: 6, 32, 3>}, {pipeline_mode = #tpu.pipeline_mode<synchronous>, transform_indices = @transform_4, window_bounds = array<i64: 6, 3, 32>}, {pipeline_mode = #tpu.pipeline_mode<synchronous>, transform_indices = @transform_5, window_bounds = array<i64: 1, 32>}, {transform_indices = @transform_6, window_bounds = array<i64: 1, 16, 32>}]} {
    %c0 = arith.constant 0 : index
    %c0_0 = arith.constant 0 : index
    %c0_1 = arith.constant 0 : index
    %0 = vector.load %arg1[%c0, %c0_0, %c0_1] : memref<1x16x32xf32, #tpu.memory_space<vmem>>, vector<1x16x32xf32>
    %1 = vector.shape_cast %0 : vector<1x16x32xf32> to vector<16x32xf32>
    %cst = arith.constant 0.000000e+00 : f32
    %2 = vector.broadcast %cst : f32 to vector<16x32xf32>
    %c0_2 = arith.constant 0 : index
    %c0_3 = arith.constant 0 : index
    %c0_4 = arith.constant 0 : index
    %3 = vector.load %arg2[%c0_2, %c0_3, %c0_4] : memref<6x32x3xf32, #tpu.memory_space<vmem>>, vector<1x32x3xf32>
    %4 = vector.shape_cast %3 : vector<1x32x3xf32> to vector<32x3xf32>
    %cst_5 = arith.constant dense<0.000000e+00> : vector<16x3xf32>
    %5 = tpu.matmul %1, %4, %cst_5 {dimension_numbers = #tpu.dot_dimension_numbers<[1], [0], [0], [1], [0, 0, 1, 1], [], []>} : vector<16x32xf32>, vector<32x3xf32>, vector<16x3xf32> -> vector<16x3xf32>
    %cst_6 = arith.constant 0.235702261 : f32
    %6 = vector.broadcast %cst_6 : f32 to vector<16x3xf32>
    %7 = arith.mulf %5, %6 : vector<16x3xf32>
    %c0_7 = arith.constant 0 : index
    %c0_8 = arith.constant 0 : index
    %c0_9 = arith.constant 0 : index
    %8 = vector.load %arg3[%c0_7, %c0_8, %c0_9] : memref<6x32x3xf32, #tpu.memory_space<vmem>>, vector<1x32x3xf32>
    %9 = vector.shape_cast %8 : vector<1x32x3xf32> to vector<32x3xf32>
    %cst_10 = arith.constant dense<0.000000e+00> : vector<16x3xf32>
    %10 = tpu.matmul %1, %9, %cst_10 {dimension_numbers = #tpu.dot_dimension_numbers<[1], [0], [0], [1], [0, 0, 1, 1], [], []>} : vector<16x32xf32>, vector<32x3xf32>, vector<16x3xf32> -> vector<16x3xf32>
    %c0_11 = arith.constant 0 : index
    %c0_12 = arith.constant 0 : index
    %c0_13 = arith.constant 0 : index
    %11 = vector.load %arg4[%c0_11, %c0_12, %c0_13] : memref<6x32x3xf32, #tpu.memory_space<vmem>>, vector<1x32x3xf32>
    %12 = vector.shape_cast %11 : vector<1x32x3xf32> to vector<32x3xf32>
    %cst_14 = arith.constant dense<0.000000e+00> : vector<16x3xf32>
    %13 = tpu.matmul %1, %12, %cst_14 {dimension_numbers = #tpu.dot_dimension_numbers<[1], [0], [0], [1], [0, 0, 1, 1], [], []>} : vector<16x32xf32>, vector<32x3xf32>, vector<16x3xf32> -> vector<16x3xf32>
    %cst_15 = arith.constant dense<0.000000e+00> : vector<16x16xf32>
    %14 = tpu.matmul %7, %10, %cst_15 {dimension_numbers = #tpu.dot_dimension_numbers<[1], [1], [0], [0], [0, 0, 1, 0], [], []>} : vector<16x3xf32>, vector<16x3xf32>, vector<16x16xf32> -> vector<16x16xf32>
    %cst_16 = arith.constant dense<0xFF800000> : vector<16xf32>
    %15 = vector.multi_reduction <maximumf>, %14, %cst_16 [1] : vector<16x16xf32> to vector<16xf32>
    %16 = vector.shape_cast %15 : vector<16xf32> to vector<16x1xf32>
    %17 = vector.broadcast %16 : vector<16x1xf32> to vector<16x16xf32>
    %18 = arith.subf %14, %17 : vector<16x16xf32>
    %19 = math.exp %18 : vector<16x16xf32>
    %cst_17 = arith.constant dense<0.000000e+00> : vector<16xf32>
    %20 = vector.multi_reduction <add>, %19, %cst_17 [1] : vector<16x16xf32> to vector<16xf32>
    %21 = vector.shape_cast %20 : vector<16xf32> to vector<16x1xf32>
    %22 = tpu.reciprocal %21 {approx = true} : vector<16x1xf32> -> vector<16x1xf32>
    %23 = vector.broadcast %22 : vector<16x1xf32> to vector<16x16xf32>
    %24 = arith.mulf %19, %23 : vector<16x16xf32>
    %cst_18 = arith.constant dense<0.000000e+00> : vector<16x3xf32>
    %25 = tpu.matmul %24, %13, %cst_18 {dimension_numbers = #tpu.dot_dimension_numbers<[1], [0], [0], [1], [0, 0, 1, 1], [], []>} : vector<16x16xf32>, vector<16x3xf32>, vector<16x3xf32> -> vector<16x3xf32>
    %c0_19 = arith.constant 0 : index
    %c0_20 = arith.constant 0 : index
    %c0_21 = arith.constant 0 : index
    %26 = vector.load %arg5[%c0_19, %c0_20, %c0_21] : memref<6x3x32xf32, #tpu.memory_space<vmem>>, vector<1x3x32xf32>
    %27 = vector.shape_cast %26 : vector<1x3x32xf32> to vector<3x32xf32>
    %cst_22 = arith.constant dense<0.000000e+00> : vector<16x32xf32>
    %28 = tpu.matmul %25, %27, %cst_22 {dimension_numbers = #tpu.dot_dimension_numbers<[1], [0], [0], [1], [0, 0, 1, 1], [], []>} : vector<16x3xf32>, vector<3x32xf32>, vector<16x32xf32> -> vector<16x32xf32>
    %29 = arith.addf %2, %28 : vector<16x32xf32>
    %c1 = arith.constant 1 : index
    %c0_23 = arith.constant 0 : index
    %c0_24 = arith.constant 0 : index
    %30 = vector.load %arg2[%c1, %c0_23, %c0_24] : memref<6x32x3xf32, #tpu.memory_space<vmem>>, vector<1x32x3xf32>
    %31 = vector.shape_cast %30 : vector<1x32x3xf32> to vector<32x3xf32>
    %cst_25 = arith.constant dense<0.000000e+00> : vector<16x3xf32>
    %32 = tpu.matmul %1, %31, %cst_25 {dimension_numbers = #tpu.dot_dimension_numbers<[1], [0], [0], [1], [0, 0, 1, 1], [], []>} : vector<16x32xf32>, vector<32x3xf32>, vector<16x3xf32> -> vector<16x3xf32>
    %cst_26 = arith.constant 0.235702261 : f32
    %33 = vector.broadcast %cst_26 : f32 to vector<16x3xf32>
    %34 = arith.mulf %32, %33 : vector<16x3xf32>
    %c1_27 = arith.constant 1 : index
    %c0_28 = arith.constant 0 : index
    %c0_29 = arith.constant 0 : index
    %35 = vector.load %arg3[%c1_27, %c0_28, %c0_29] : memref<6x32x3xf32, #tpu.memory_space<vmem>>, vector<1x32x3xf32>
    %36 = vector.shape_cast %35 : vector<1x32x3xf32> to vector<32x3xf32>
    %cst_30 = arith.constant dense<0.000000e+00> : vector<16x3xf32>
    %37 = tpu.matmul %1, %36, %cst_30 {dimension_numbers = #tpu.dot_dimension_numbers<[1], [0], [0], [1], [0, 0, 1, 1], [], []>} : vector<16x32xf32>, vector<32x3xf32>, vector<16x3xf32> -> vector<16x3xf32>
    %c1_31 = arith.constant 1 : index
    %c0_32 = arith.constant 0 : index
    %c0_33 = arith.constant 0 : index
    %38 = vector.load %arg4[%c1_31, %c0_32, %c0_33] : memref<6x32x3xf32, #tpu.memory_space<vmem>>, vector<1x32x3xf32>
    %39 = vector.shape_cast %38 : vector<1x32x3xf32> to vector<32x3xf32>
    %cst_34 = arith.constant dense<0.000000e+00> : vector<16x3xf32>
    %40 = tpu.matmul %1, %39, %cst_34 {dimension_numbers = #tpu.dot_dimension_numbers<[1], [0], [0], [1], [0, 0, 1, 1], [], []>} : vector<16x32xf32>, vector<32x3xf32>, vector<16x3xf32> -> vector<16x3xf32>
    %cst_35 = arith.constant dense<0.000000e+00> : vector<16x16xf32>
    %41 = tpu.matmul %34, %37, %cst_35 {dimension_numbers = #tpu.dot_dimension_numbers<[1], [1], [0], [0], [0, 0, 1, 0], [], []>} : vector<16x3xf32>, vector<16x3xf32>, vector<16x16xf32> -> vector<16x16xf32>
    %cst_36 = arith.constant dense<0xFF800000> : vector<16xf32>
    %42 = vector.multi_reduction <maximumf>, %41, %cst_36 [1] : vector<16x16xf32> to vector<16xf32>
    %43 = vector.shape_cast %42 : vector<16xf32> to vector<16x1xf32>
    %44 = vector.broadcast %43 : vector<16x1xf32> to vector<16x16xf32>
    %45 = arith.subf %41, %44 : vector<16x16xf32>
    %46 = math.exp %45 : vector<16x16xf32>
    %cst_37 = arith.constant dense<0.000000e+00> : vector<16xf32>
    %47 = vector.multi_reduction <add>, %46, %cst_37 [1] : vector<16x16xf32> to vector<16xf32>
    %48 = vector.shape_cast %47 : vector<16xf32> to vector<16x1xf32>
    %49 = tpu.reciprocal %48 {approx = true} : vector<16x1xf32> -> vector<16x1xf32>
    %50 = vector.broadcast %49 : vector<16x1xf32> to vector<16x16xf32>
    %51 = arith.mulf %46, %50 : vector<16x16xf32>
    %cst_38 = arith.constant dense<0.000000e+00> : vector<16x3xf32>
    %52 = tpu.matmul %51, %40, %cst_38 {dimension_numbers = #tpu.dot_dimension_numbers<[1], [0], [0], [1], [0, 0, 1, 1], [], []>} : vector<16x16xf32>, vector<16x3xf32>, vector<16x3xf32> -> vector<16x3xf32>
    %c1_39 = arith.constant 1 : index
    %c0_40 = arith.constant 0 : index
    %c0_41 = arith.constant 0 : index
    %53 = vector.load %arg5[%c1_39, %c0_40, %c0_41] : memref<6x3x32xf32, #tpu.memory_space<vmem>>, vector<1x3x32xf32>
    %54 = vector.shape_cast %53 : vector<1x3x32xf32> to vector<3x32xf32>
    %cst_42 = arith.constant dense<0.000000e+00> : vector<16x32xf32>
    %55 = tpu.matmul %52, %54, %cst_42 {dimension_numbers = #tpu.dot_dimension_numbers<[1], [0], [0], [1], [0, 0, 1, 1], [], []>} : vector<16x3xf32>, vector<3x32xf32>, vector<16x32xf32> -> vector<16x32xf32>
    %56 = arith.addf %29, %55 : vector<16x32xf32>
    %c2 = arith.constant 2 : index
    %c0_43 = arith.constant 0 : index
    %c0_44 = arith.constant 0 : index
    %57 = vector.load %arg2[%c2, %c0_43, %c0_44] : memref<6x32x3xf32, #tpu.memory_space<vmem>>, vector<1x32x3xf32>
    %58 = vector.shape_cast %57 : vector<1x32x3xf32> to vector<32x3xf32>
    %cst_45 = arith.constant dense<0.000000e+00> : vector<16x3xf32>
    %59 = tpu.matmul %1, %58, %cst_45 {dimension_numbers = #tpu.dot_dimension_numbers<[1], [0], [0], [1], [0, 0, 1, 1], [], []>} : vector<16x32xf32>, vector<32x3xf32>, vector<16x3xf32> -> vector<16x3xf32>
    %cst_46 = arith.constant 0.235702261 : f32
    %60 = vector.broadcast %cst_46 : f32 to vector<16x3xf32>
    %61 = arith.mulf %59, %60 : vector<16x3xf32>
    %c2_47 = arith.constant 2 : index
    %c0_48 = arith.constant 0 : index
    %c0_49 = arith.constant 0 : index
    %62 = vector.load %arg3[%c2_47, %c0_48, %c0_49] : memref<6x32x3xf32, #tpu.memory_space<vmem>>, vector<1x32x3xf32>
    %63 = vector.shape_cast %62 : vector<1x32x3xf32> to vector<32x3xf32>
    %cst_50 = arith.constant dense<0.000000e+00> : vector<16x3xf32>
    %64 = tpu.matmul %1, %63, %cst_50 {dimension_numbers = #tpu.dot_dimension_numbers<[1], [0], [0], [1], [0, 0, 1, 1], [], []>} : vector<16x32xf32>, vector<32x3xf32>, vector<16x3xf32> -> vector<16x3xf32>
    %c2_51 = arith.constant 2 : index
    %c0_52 = arith.constant 0 : index
    %c0_53 = arith.constant 0 : index
    %65 = vector.load %arg4[%c2_51, %c0_52, %c0_53] : memref<6x32x3xf32, #tpu.memory_space<vmem>>, vector<1x32x3xf32>
    %66 = vector.shape_cast %65 : vector<1x32x3xf32> to vector<32x3xf32>
    %cst_54 = arith.constant dense<0.000000e+00> : vector<16x3xf32>
    %67 = tpu.matmul %1, %66, %cst_54 {dimension_numbers = #tpu.dot_dimension_numbers<[1], [0], [0], [1], [0, 0, 1, 1], [], []>} : vector<16x32xf32>, vector<32x3xf32>, vector<16x3xf32> -> vector<16x3xf32>
    %cst_55 = arith.constant dense<0.000000e+00> : vector<16x16xf32>
    %68 = tpu.matmul %61, %64, %cst_55 {dimension_numbers = #tpu.dot_dimension_numbers<[1], [1], [0], [0], [0, 0, 1, 0], [], []>} : vector<16x3xf32>, vector<16x3xf32>, vector<16x16xf32> -> vector<16x16xf32>
    %cst_56 = arith.constant dense<0xFF800000> : vector<16xf32>
    %69 = vector.multi_reduction <maximumf>, %68, %cst_56 [1] : vector<16x16xf32> to vector<16xf32>
    %70 = vector.shape_cast %69 : vector<16xf32> to vector<16x1xf32>
    %71 = vector.broadcast %70 : vector<16x1xf32> to vector<16x16xf32>
    %72 = arith.subf %68, %71 : vector<16x16xf32>
    %73 = math.exp %72 : vector<16x16xf32>
    %cst_57 = arith.constant dense<0.000000e+00> : vector<16xf32>
    %74 = vector.multi_reduction <add>, %73, %cst_57 [1] : vector<16x16xf32> to vector<16xf32>
    %75 = vector.shape_cast %74 : vector<16xf32> to vector<16x1xf32>
    %76 = tpu.reciprocal %75 {approx = true} : vector<16x1xf32> -> vector<16x1xf32>
    %77 = vector.broadcast %76 : vector<16x1xf32> to vector<16x16xf32>
    %78 = arith.mulf %73, %77 : vector<16x16xf32>
    %cst_58 = arith.constant dense<0.000000e+00> : vector<16x3xf32>
    %79 = tpu.matmul %78, %67, %cst_58 {dimension_numbers = #tpu.dot_dimension_numbers<[1], [0], [0], [1], [0, 0, 1, 1], [], []>} : vector<16x16xf32>, vector<16x3xf32>, vector<16x3xf32> -> vector<16x3xf32>
    %c2_59 = arith.constant 2 : index
    %c0_60 = arith.constant 0 : index
    %c0_61 = arith.constant 0 : index
    %80 = vector.load %arg5[%c2_59, %c0_60, %c0_61] : memref<6x3x32xf32, #tpu.memory_space<vmem>>, vector<1x3x32xf32>
    %81 = vector.shape_cast %80 : vector<1x3x32xf32> to vector<3x32xf32>
    %cst_62 = arith.constant dense<0.000000e+00> : vector<16x32xf32>
    %82 = tpu.matmul %79, %81, %cst_62 {dimension_numbers = #tpu.dot_dimension_numbers<[1], [0], [0], [1], [0, 0, 1, 1], [], []>} : vector<16x3xf32>, vector<3x32xf32>, vector<16x32xf32> -> vector<16x32xf32>
    %83 = arith.addf %56, %82 : vector<16x32xf32>
    %c3 = arith.constant 3 : index
    %c0_63 = arith.constant 0 : index
    %c0_64 = arith.constant 0 : index
    %84 = vector.load %arg2[%c3, %c0_63, %c0_64] : memref<6x32x3xf32, #tpu.memory_space<vmem>>, vector<1x32x3xf32>
    %85 = vector.shape_cast %84 : vector<1x32x3xf32> to vector<32x3xf32>
    %cst_65 = arith.constant dense<0.000000e+00> : vector<16x3xf32>
    %86 = tpu.matmul %1, %85, %cst_65 {dimension_numbers = #tpu.dot_dimension_numbers<[1], [0], [0], [1], [0, 0, 1, 1], [], []>} : vector<16x32xf32>, vector<32x3xf32>, vector<16x3xf32> -> vector<16x3xf32>
    %cst_66 = arith.constant 0.235702261 : f32
    %87 = vector.broadcast %cst_66 : f32 to vector<16x3xf32>
    %88 = arith.mulf %86, %87 : vector<16x3xf32>
    %c3_67 = arith.constant 3 : index
    %c0_68 = arith.constant 0 : index
    %c0_69 = arith.constant 0 : index
    %89 = vector.load %arg3[%c3_67, %c0_68, %c0_69] : memref<6x32x3xf32, #tpu.memory_space<vmem>>, vector<1x32x3xf32>
    %90 = vector.shape_cast %89 : vector<1x32x3xf32> to vector<32x3xf32>
    %cst_70 = arith.constant dense<0.000000e+00> : vector<16x3xf32>
    %91 = tpu.matmul %1, %90, %cst_70 {dimension_numbers = #tpu.dot_dimension_numbers<[1], [0], [0], [1], [0, 0, 1, 1], [], []>} : vector<16x32xf32>, vector<32x3xf32>, vector<16x3xf32> -> vector<16x3xf32>
    %c3_71 = arith.constant 3 : index
    %c0_72 = arith.constant 0 : index
    %c0_73 = arith.constant 0 : index
    %92 = vector.load %arg4[%c3_71, %c0_72, %c0_73] : memref<6x32x3xf32, #tpu.memory_space<vmem>>, vector<1x32x3xf32>
    %93 = vector.shape_cast %92 : vector<1x32x3xf32> to vector<32x3xf32>
    %cst_74 = arith.constant dense<0.000000e+00> : vector<16x3xf32>
    %94 = tpu.matmul %1, %93, %cst_74 {dimension_numbers = #tpu.dot_dimension_numbers<[1], [0], [0], [1], [0, 0, 1, 1], [], []>} : vector<16x32xf32>, vector<32x3xf32>, vector<16x3xf32> -> vector<16x3xf32>
    %cst_75 = arith.constant dense<0.000000e+00> : vector<16x16xf32>
    %95 = tpu.matmul %88, %91, %cst_75 {dimension_numbers = #tpu.dot_dimension_numbers<[1], [1], [0], [0], [0, 0, 1, 0], [], []>} : vector<16x3xf32>, vector<16x3xf32>, vector<16x16xf32> -> vector<16x16xf32>
    %cst_76 = arith.constant dense<0xFF800000> : vector<16xf32>
    %96 = vector.multi_reduction <maximumf>, %95, %cst_76 [1] : vector<16x16xf32> to vector<16xf32>
    %97 = vector.shape_cast %96 : vector<16xf32> to vector<16x1xf32>
    %98 = vector.broadcast %97 : vector<16x1xf32> to vector<16x16xf32>
    %99 = arith.subf %95, %98 : vector<16x16xf32>
    %100 = math.exp %99 : vector<16x16xf32>
    %cst_77 = arith.constant dense<0.000000e+00> : vector<16xf32>
    %101 = vector.multi_reduction <add>, %100, %cst_77 [1] : vector<16x16xf32> to vector<16xf32>
    %102 = vector.shape_cast %101 : vector<16xf32> to vector<16x1xf32>
    %103 = tpu.reciprocal %102 {approx = true} : vector<16x1xf32> -> vector<16x1xf32>
    %104 = vector.broadcast %103 : vector<16x1xf32> to vector<16x16xf32>
    %105 = arith.mulf %100, %104 : vector<16x16xf32>
    %cst_78 = arith.constant dense<0.000000e+00> : vector<16x3xf32>
    %106 = tpu.matmul %105, %94, %cst_78 {dimension_numbers = #tpu.dot_dimension_numbers<[1], [0], [0], [1], [0, 0, 1, 1], [], []>} : vector<16x16xf32>, vector<16x3xf32>, vector<16x3xf32> -> vector<16x3xf32>
    %c3_79 = arith.constant 3 : index
    %c0_80 = arith.constant 0 : index
    %c0_81 = arith.constant 0 : index
    %107 = vector.load %arg5[%c3_79, %c0_80, %c0_81] : memref<6x3x32xf32, #tpu.memory_space<vmem>>, vector<1x3x32xf32>
    %108 = vector.shape_cast %107 : vector<1x3x32xf32> to vector<3x32xf32>
    %cst_82 = arith.constant dense<0.000000e+00> : vector<16x32xf32>
    %109 = tpu.matmul %106, %108, %cst_82 {dimension_numbers = #tpu.dot_dimension_numbers<[1], [0], [0], [1], [0, 0, 1, 1], [], []>} : vector<16x3xf32>, vector<3x32xf32>, vector<16x32xf32> -> vector<16x32xf32>
    %110 = arith.addf %83, %109 : vector<16x32xf32>
    %c4 = arith.constant 4 : index
    %c0_83 = arith.constant 0 : index
    %c0_84 = arith.constant 0 : index
    %111 = vector.load %arg2[%c4, %c0_83, %c0_84] : memref<6x32x3xf32, #tpu.memory_space<vmem>>, vector<1x32x3xf32>
    %112 = vector.shape_cast %111 : vector<1x32x3xf32> to vector<32x3xf32>
    %cst_85 = arith.constant dense<0.000000e+00> : vector<16x3xf32>
    %113 = tpu.matmul %1, %112, %cst_85 {dimension_numbers = #tpu.dot_dimension_numbers<[1], [0], [0], [1], [0, 0, 1, 1], [], []>} : vector<16x32xf32>, vector<32x3xf32>, vector<16x3xf32> -> vector<16x3xf32>
    %cst_86 = arith.constant 0.235702261 : f32
    %114 = vector.broadcast %cst_86 : f32 to vector<16x3xf32>
    %115 = arith.mulf %113, %114 : vector<16x3xf32>
    %c4_87 = arith.constant 4 : index
    %c0_88 = arith.constant 0 : index
    %c0_89 = arith.constant 0 : index
    %116 = vector.load %arg3[%c4_87, %c0_88, %c0_89] : memref<6x32x3xf32, #tpu.memory_space<vmem>>, vector<1x32x3xf32>
    %117 = vector.shape_cast %116 : vector<1x32x3xf32> to vector<32x3xf32>
    %cst_90 = arith.constant dense<0.000000e+00> : vector<16x3xf32>
    %118 = tpu.matmul %1, %117, %cst_90 {dimension_numbers = #tpu.dot_dimension_numbers<[1], [0], [0], [1], [0, 0, 1, 1], [], []>} : vector<16x32xf32>, vector<32x3xf32>, vector<16x3xf32> -> vector<16x3xf32>
    %c4_91 = arith.constant 4 : index
    %c0_92 = arith.constant 0 : index
    %c0_93 = arith.constant 0 : index
    %119 = vector.load %arg4[%c4_91, %c0_92, %c0_93] : memref<6x32x3xf32, #tpu.memory_space<vmem>>, vector<1x32x3xf32>
    %120 = vector.shape_cast %119 : vector<1x32x3xf32> to vector<32x3xf32>
    %cst_94 = arith.constant dense<0.000000e+00> : vector<16x3xf32>
    %121 = tpu.matmul %1, %120, %cst_94 {dimension_numbers = #tpu.dot_dimension_numbers<[1], [0], [0], [1], [0, 0, 1, 1], [], []>} : vector<16x32xf32>, vector<32x3xf32>, vector<16x3xf32> -> vector<16x3xf32>
    %cst_95 = arith.constant dense<0.000000e+00> : vector<16x16xf32>
    %122 = tpu.matmul %115, %118, %cst_95 {dimension_numbers = #tpu.dot_dimension_numbers<[1], [1], [0], [0], [0, 0, 1, 0], [], []>} : vector<16x3xf32>, vector<16x3xf32>, vector<16x16xf32> -> vector<16x16xf32>
    %cst_96 = arith.constant dense<0xFF800000> : vector<16xf32>
    %123 = vector.multi_reduction <maximumf>, %122, %cst_96 [1] : vector<16x16xf32> to vector<16xf32>
    %124 = vector.shape_cast %123 : vector<16xf32> to vector<16x1xf32>
    %125 = vector.broadcast %124 : vector<16x1xf32> to vector<16x16xf32>
    %126 = arith.subf %122, %125 : vector<16x16xf32>
    %127 = math.exp %126 : vector<16x16xf32>
    %cst_97 = arith.constant dense<0.000000e+00> : vector<16xf32>
    %128 = vector.multi_reduction <add>, %127, %cst_97 [1] : vector<16x16xf32> to vector<16xf32>
    %129 = vector.shape_cast %128 : vector<16xf32> to vector<16x1xf32>
    %130 = tpu.reciprocal %129 {approx = true} : vector<16x1xf32> -> vector<16x1xf32>
    %131 = vector.broadcast %130 : vector<16x1xf32> to vector<16x16xf32>
    %132 = arith.mulf %127, %131 : vector<16x16xf32>
    %cst_98 = arith.constant dense<0.000000e+00> : vector<16x3xf32>
    %133 = tpu.matmul %132, %121, %cst_98 {dimension_numbers = #tpu.dot_dimension_numbers<[1], [0], [0], [1], [0, 0, 1, 1], [], []>} : vector<16x16xf32>, vector<16x3xf32>, vector<16x3xf32> -> vector<16x3xf32>
    %c4_99 = arith.constant 4 : index
    %c0_100 = arith.constant 0 : index
    %c0_101 = arith.constant 0 : index
    %134 = vector.load %arg5[%c4_99, %c0_100, %c0_101] : memref<6x3x32xf32, #tpu.memory_space<vmem>>, vector<1x3x32xf32>
    %135 = vector.shape_cast %134 : vector<1x3x32xf32> to vector<3x32xf32>
    %cst_102 = arith.constant dense<0.000000e+00> : vector<16x32xf32>
    %136 = tpu.matmul %133, %135, %cst_102 {dimension_numbers = #tpu.dot_dimension_numbers<[1], [0], [0], [1], [0, 0, 1, 1], [], []>} : vector<16x3xf32>, vector<3x32xf32>, vector<16x32xf32> -> vector<16x32xf32>
    %137 = arith.addf %110, %136 : vector<16x32xf32>
    %c5 = arith.constant 5 : index
    %c0_103 = arith.constant 0 : index
    %c0_104 = arith.constant 0 : index
    %138 = vector.load %arg2[%c5, %c0_103, %c0_104] : memref<6x32x3xf32, #tpu.memory_space<vmem>>, vector<1x32x3xf32>
    %139 = vector.shape_cast %138 : vector<1x32x3xf32> to vector<32x3xf32>
    %cst_105 = arith.constant dense<0.000000e+00> : vector<16x3xf32>
    %140 = tpu.matmul %1, %139, %cst_105 {dimension_numbers = #tpu.dot_dimension_numbers<[1], [0], [0], [1], [0, 0, 1, 1], [], []>} : vector<16x32xf32>, vector<32x3xf32>, vector<16x3xf32> -> vector<16x3xf32>
    %cst_106 = arith.constant 0.235702261 : f32
    %141 = vector.broadcast %cst_106 : f32 to vector<16x3xf32>
    %142 = arith.mulf %140, %141 : vector<16x3xf32>
    %c5_107 = arith.constant 5 : index
    %c0_108 = arith.constant 0 : index
    %c0_109 = arith.constant 0 : index
    %143 = vector.load %arg3[%c5_107, %c0_108, %c0_109] : memref<6x32x3xf32, #tpu.memory_space<vmem>>, vector<1x32x3xf32>
    %144 = vector.shape_cast %143 : vector<1x32x3xf32> to vector<32x3xf32>
    %cst_110 = arith.constant dense<0.000000e+00> : vector<16x3xf32>
    %145 = tpu.matmul %1, %144, %cst_110 {dimension_numbers = #tpu.dot_dimension_numbers<[1], [0], [0], [1], [0, 0, 1, 1], [], []>} : vector<16x32xf32>, vector<32x3xf32>, vector<16x3xf32> -> vector<16x3xf32>
    %c5_111 = arith.constant 5 : index
    %c0_112 = arith.constant 0 : index
    %c0_113 = arith.constant 0 : index
    %146 = vector.load %arg4[%c5_111, %c0_112, %c0_113] : memref<6x32x3xf32, #tpu.memory_space<vmem>>, vector<1x32x3xf32>
    %147 = vector.shape_cast %146 : vector<1x32x3xf32> to vector<32x3xf32>
    %cst_114 = arith.constant dense<0.000000e+00> : vector<16x3xf32>
    %148 = tpu.matmul %1, %147, %cst_114 {dimension_numbers = #tpu.dot_dimension_numbers<[1], [0], [0], [1], [0, 0, 1, 1], [], []>} : vector<16x32xf32>, vector<32x3xf32>, vector<16x3xf32> -> vector<16x3xf32>
    %cst_115 = arith.constant dense<0.000000e+00> : vector<16x16xf32>
    %149 = tpu.matmul %142, %145, %cst_115 {dimension_numbers = #tpu.dot_dimension_numbers<[1], [1], [0], [0], [0, 0, 1, 0], [], []>} : vector<16x3xf32>, vector<16x3xf32>, vector<16x16xf32> -> vector<16x16xf32>
    %cst_116 = arith.constant dense<0xFF800000> : vector<16xf32>
    %150 = vector.multi_reduction <maximumf>, %149, %cst_116 [1] : vector<16x16xf32> to vector<16xf32>
    %151 = vector.shape_cast %150 : vector<16xf32> to vector<16x1xf32>
    %152 = vector.broadcast %151 : vector<16x1xf32> to vector<16x16xf32>
    %153 = arith.subf %149, %152 : vector<16x16xf32>
    %154 = math.exp %153 : vector<16x16xf32>
    %cst_117 = arith.constant dense<0.000000e+00> : vector<16xf32>
    %155 = vector.multi_reduction <add>, %154, %cst_117 [1] : vector<16x16xf32> to vector<16xf32>
    %156 = vector.shape_cast %155 : vector<16xf32> to vector<16x1xf32>
    %157 = tpu.reciprocal %156 {approx = true} : vector<16x1xf32> -> vector<16x1xf32>
    %158 = vector.broadcast %157 : vector<16x1xf32> to vector<16x16xf32>
    %159 = arith.mulf %154, %158 : vector<16x16xf32>
    %cst_118 = arith.constant dense<0.000000e+00> : vector<16x3xf32>
    %160 = tpu.matmul %159, %148, %cst_118 {dimension_numbers = #tpu.dot_dimension_numbers<[1], [0], [0], [1], [0, 0, 1, 1], [], []>} : vector<16x16xf32>, vector<16x3xf32>, vector<16x3xf32> -> vector<16x3xf32>
    %c5_119 = arith.constant 5 : index
    %c0_120 = arith.constant 0 : index
    %c0_121 = arith.constant 0 : index
    %161 = vector.load %arg5[%c5_119, %c0_120, %c0_121] : memref<6x3x32xf32, #tpu.memory_space<vmem>>, vector<1x3x32xf32>
    %162 = vector.shape_cast %161 : vector<1x3x32xf32> to vector<3x32xf32>
    %cst_122 = arith.constant dense<0.000000e+00> : vector<16x32xf32>
    %163 = tpu.matmul %160, %162, %cst_122 {dimension_numbers = #tpu.dot_dimension_numbers<[1], [0], [0], [1], [0, 0, 1, 1], [], []>} : vector<16x3xf32>, vector<3x32xf32>, vector<16x32xf32> -> vector<16x32xf32>
    %164 = arith.addf %137, %163 : vector<16x32xf32>
    %c0_123 = arith.constant 0 : index
    %c0_124 = arith.constant 0 : index
    %165 = vector.load %arg6[%c0_123, %c0_124] : memref<1x32xf32, #tpu.memory_space<vmem>>, vector<1x32xf32>
    %166 = vector.broadcast %165 : vector<1x32xf32> to vector<16x32xf32>
    %167 = arith.addf %164, %166 : vector<16x32xf32>
    %c0_125 = arith.constant 0 : index
    %c0_126 = arith.constant 0 : index
    %c0_127 = arith.constant 0 : index
    %168 = vector.load %arg7[%c0_125, %c0_126, %c0_127] : memref<1x16x32xf32, #tpu.memory_space<vmem>>, vector<1x16x32xf32>
    %169 = vector.shape_cast %168 : vector<1x16x32xf32> to vector<16x32xf32>
    %170 = vector.shape_cast %167 : vector<16x32xf32> to vector<1x16x32xf32>
    tpu.vector_store %arg7[%c0_125, %c0_126, %c0_127], %170 {strides = array<i32>} : memref<1x16x32xf32, #tpu.memory_space<vmem>>, vector<1x16x32xf32>,
    return
  }
  func.func @transform_0(%arg0: i32) -> (i32, i32, i32) {
    %c0_i32 = arith.constant 0 : i32
    %c0_i32_0 = arith.constant 0 : i32
    %c0_i32_1 = arith.constant 0 : i32
    return %arg0, %c0_i32, %c0_i32_0 : i32, i32, i32
  }
  func.func @transform_1(%arg0: i32) -> (i32, i32, i32) {
    %c0_i32 = arith.constant 0 : i32
    %c0_i32_0 = arith.constant 0 : i32
    %c0_i32_1 = arith.constant 0 : i32
    %c0_i32_2 = arith.constant 0 : i32
    return %c0_i32, %c0_i32_0, %c0_i32_1 : i32, i32, i32
  }
  func.func @transform_2(%arg0: i32) -> (i32, i32, i32) {
    %c0_i32 = arith.constant 0 : i32
    %c0_i32_0 = arith.constant 0 : i32
    %c0_i32_1 = arith.constant 0 : i32
    %c0_i32_2 = arith.constant 0 : i32
    return %c0_i32, %c0_i32_0, %c0_i32_1 : i32, i32, i32
  }
  func.func @transform_3(%arg0: i32) -> (i32, i32, i32) {
    %c0_i32 = arith.constant 0 : i32
    %c0_i32_0 = arith.constant 0 : i32
    %c0_i32_1 = arith.constant 0 : i32
    %c0_i32_2 = arith.constant 0 : i32
    return %c0_i32, %c0_i32_0, %c0_i32_1 : i32, i32, i32
  }
  func.func @transform_4(%arg0: i32) -> (i32, i32, i32) {
    %c0_i32 = arith.constant 0 : i32
    %c0_i32_0 = arith.constant 0 : i32
    %c0_i32_1 = arith.constant 0 : i32
    %c0_i32_2 = arith.constant 0 : i32
    return %c0_i32, %c0_i32_0, %c0_i32_1 : i32, i32, i32
  }
  func.func @transform_5(%arg0: i32) -> (i32, i32) {
    %c0_i32 = arith.constant 0 : i32
    %c0_i32_0 = arith.constant 0 : i32
    %c0_i32_1 = arith.constant 0 : i32
    return %c0_i32, %c0_i32_0 : i32, i32
  }
  func.func @transform_6(%arg0: i32) -> (i32, i32, i32) {
    %c0_i32 = arith.constant 0 : i32
    %c0_i32_0 = arith.constant 0 : i32
    %c0_i32_1 = arith.constant 0 : i32
    return %arg0, %c0_i32, %c0_i32_0 : i32, i32, i32
  }
}

</mosaic_0001>

<bundles_post_ra>
// kernel: attention1_forward.1
= control target key start
LH: loop header
LB: loop body
LE: loop exit
PB: predicated region body
PF: predicated region fallthrough
CT: control target
= control target key end

     0   :  { %11 = vsyncpa [#allocation3], 0  ;;  %s5048_s0 = inlined_call_operand.vmem [shape: f32[2,16,32], index: 0, kind: input, shape index: {}]   ;;  %s5049_s1 = inlined_call_operand.vmem [shape: f32[6,32,3], index: 1, kind: input, shape index: {}]   ;;  %s5050_s2 = inlined_call_operand.vmem [shape: f32[6,32,3], index: 2, kind: input, shape index: {}]   ;;  %s5051_s3 = inlined_call_operand.vmem [shape: f32[6,32,3], index: 3, kind: input, shape index: {}]   ;;  %s5052_s4 = inlined_call_operand.vmem [shape: f32[6,3,32], index: 4, kind: input, shape index: {}]   ;;  %s5053_s5 = inlined_call_operand.vmem [shape: f32[1,32], index: 5, kind: input, shape index: {}]   ;;  %s5054_s6 = inlined_call_operand.hbm [shape: f32[2,16,32], index: 6, kind: output, shape index: {}]  }
   0x1   :  { %13 = vsyncpa [#allocation3 + $0x1], 0  ;;  %s4522_s21 = smov 0   ;;  %s4524_s22 = smov 0  }
   0x2   :  { %s4526_s23 = smov 0   ;;  %s4528_s24 = smov 0  }
   0x3 LB: > { %s4543_s25 = sadd.s32 4294967295, %s4482_s24   ;;  %s3461_s26 = sadd.s32 4294967294, %s4482_s24   ;;  %s4482_s24 = sphi %s4528_s24, %s5062_s24   ;;  %s4478_s23 = sphi %s4526_s23, %s5061_s23   ;;  %s4474_s22 = sphi %s4524_s22, %s5060_s22   ;;  %s4470_s21 = sphi %s4522_s21, %s5059_s21  }
   0x4   : > { %s4547_s27 = sadd.s32 1, %s4482_s24   ;;  %s157_s28 = sadd.s32 1, %s4478_s23 }
   0x5   : > { %s154_s29 = ssub.s32 %s4482_s24, %s4547_s27  ;;  %p167_p0 = scmp.ne.s32.totalorder %s4478_s23, %s4474_s22 }
   0x6   : > { %p155_p1 = scmp.eq.s32.totalorder %s154_s29, 0  ;;  %p168_p2 = scmp.eq.s32.totalorder %s4543_s25, 1 }
   0x7   : > { %p173_p3 = scmp.ne.s32.totalorder %s4474_s22, %s4470_s21  ;;  %p174_p4 = scmp.eq.s32.totalorder %s3461_s26, 1 }
   0x8   : > { %s4558_s30 = scalar_select %p155_p1, %s4478_s23, %s157_s28  }
   0x9   : > { %p4560_p5 = por %p168_p2, %p167_p0  ;;  %p4564_p6 = por %p174_p4, %p173_p3 }
   0xa   : > { %p3464_p7 = scmp.ge.s32.totalorder %s4482_s24, 1  ;;  %p215_p8 = scmp.lt.s32.totalorder %s4482_s24, 3 }
   0xc   : > { %p216_p9 = pnand %p3464_p7, %p215_p8 }
   0xd   : > { %v340_v0 = vld [vmem:[%s5050_s2] sm:$0xff] (!%p216_p9)  ;;  %v341_v1 = vld [vmem:[%s5050_s2 + $0x8] sm:$0xff] (!%p216_p9)  ;;  %v342_v2 = vld [vmem:[%s5050_s2 + $0x10] sm:$0xff] (!%p216_p9)  ;;  %p245_p10 = scmp.lt.s32.totalorder (!%p216_p9), %s4543_s25, 1  ;;  %vm256_vm0 = vcmask (!%p216_p9), 261120   ;;  %vm498_vm1 = vcmask (!%p216_p9), 23552  }
   0xe   : > { %219 = sbr.rel (%p216_p9) target bundleno = 5877 (0x16f5), region = 44  ;;  %v4125_v3 = vpack.c.bf16 (!%p216_p9), %v341_v1, %v340_v0  ;;  %v343_v4 = vld [vmem:[%s5050_s2 + $0x18] sm:$0xff] (!%p216_p9)  ;;  %v252_v5 = vld [vmem:[%s5049_s1] sm:$0xff] (!%p216_p9)  ;;  %v253_v6 = vld [vmem:[%s5049_s1 + $0x8] sm:$0xff] (!%p216_p9)  ;;  %vm586_vm3 = vcmask (!%p216_p9), 130048   ;;  %vm1131_vm4 = vcmask (!%p216_p9), 1042432  }
   0xf   : > { %v4129_v7 = vpack.c.bf16 (!%p216_p9), %v343_v4, %v342_v2  ;;  %v4117_v8 = vpack.c.bf16 (!%p216_p9), %v253_v6, %v252_v5  ;;  %v254_v9 = vld [vmem:[%s5049_s1 + $0x10] sm:$0xff] (!%p216_p9)  ;;  %v255_v10 = vld [vmem:[%s5049_s1 + $0x18] sm:$0xff] (!%p216_p9)  ;;  %vm4615_vm2 = vmpackc.low (!%p216_p9), %vm498_vm1, %vm498_vm1  ;;  %s242_s20 = sand.u32 (!%p216_p9), 1, %s4474_s22   ;;  %s4484_s16 = smov (!%p216_p9), [#allocation2]  }
  0x10   : > { %4126 = vmatprep.subr.bf16.mxu1 (!%p216_p9), %v4125_v3  ;;  %v4121_v11 = vpack.c.bf16 (!%p216_p9), %v255_v10, %v254_v9  ;;  %v419_v22 = vld [vmem:[%s5051_s3] sm:$0xff] (!%p216_p9)  ;;  %v420_v23 = vld [vmem:[%s5051_s3 + $0x8] sm:$0xff] (!%p216_p9)  ;;  %v421_v24 = vld [vmem:[%s5051_s3 + $0x10] sm:$0xff] (!%p216_p9)  ;;  %s5007_s15 = scalar_lea.sflag (!%p216_p9), [#allocation3], %s242_s20  ;;  %s4424_s17 = sshll.u32 (!%p216_p9), %s4484_s16, 4  ;;  %s4425_s17 = int_to_ptr.vmem [resolvable:$false] %s4424_s17 }
  0x11   : > { %4128 = vmatpush3.bf16.msra.mxu1 (!%p216_p9), %v4125_v3  ;;  %4118 = vmatprep.subr.bf16.mxu0 (!%p216_p9), %v4117_v8  ;;  %v4133_v25 = vpack.c.bf16 (!%p216_p9), %v420_v23, %v419_v22  ;;  %v422_v26 = vld [vmem:[%s5051_s3 + $0x18] sm:$0xff] (!%p216_p9)  ;;  %v3486_v42 = vld [vmem:[%s5050_s2 + $0x20] sm:$0xff] (!%p216_p9)  ;;  %v3487_v43 = vld [vmem:[%s5050_s2 + $0x28] sm:$0xff] (!%p216_p9)  ;;  %s4426_s18 = scalar_lea.vmem (!%p216_p9), %s4425_s17, 512 }
  0x12   : > { %4130 = vmatprep.subr.bf16.mxu1 (!%p216_p9), %v4129_v7  ;;  %4120 = vmatpush3.bf16.msra.mxu0 (!%p216_p9), %v4117_v8  ;;  %v4137_v27 = vpack.c.bf16 (!%p216_p9), %v422_v26, %v421_v24  ;;  %v4159_v44 = vpack.c.bf16 (!%p216_p9), %v3487_v43, %v3486_v42  ;;  %v3488_v48 = vld [vmem:[%s5050_s2 + $0x30] sm:$0xff] (!%p216_p9)  ;;  %v3489_v49 = vld [vmem:[%s5050_s2 + $0x38] sm:$0xff] (!%p216_p9)  ;;  %v3480_v51 = vld [vmem:[%s5049_s1 + $0x20] sm:$0xff] (!%p216_p9) }
  0x13   : > { %4122 = vmatprep.subr.bf16.mxu0 (!%p216_p9), %v4121_v11  ;;  %v4163_v50 = vpack.c.bf16 (!%p216_p9), %v3489_v49, %v3488_v48  ;;  %v3481_v52 = vld [vmem:[%s5049_s1 + $0x28] sm:$0xff] (!%p216_p9)  ;;  %v3482_v58 = vld [vmem:[%s5049_s1 + $0x30] sm:$0xff] (!%p216_p9)  ;;  %v3483_v59 = vld [vmem:[%s5049_s1 + $0x38] sm:$0xff] (!%p216_p9) }
  0x14   : > { %v4151_v53 = vpack.c.bf16 (!%p216_p9), %v3481_v52, %v3480_v51  ;;  %v4155_v62 = vpack.c.bf16 (!%p216_p9), %v3483_v59, %v3482_v58  ;;  %v3492_v8 = vld [vmem:[%s5051_s3 + $0x20] sm:$0xff] (!%p216_p9)  ;;  %v3493_v9 = vld [vmem:[%s5051_s3 + $0x28] sm:$0xff] (!%p216_p9)  ;;  %v3494_v10 = vld [vmem:[%s5051_s3 + $0x30] sm:$0xff] (!%p216_p9) }
  0x15   : > { %s246_s26 = scalar_select %p245_p10, %s4543_s25, 1  ;;  %4132 = vmatpush3.bf16.msra.mxu1 %v4129_v7  ;;  %v3511_v42 = vld [vmem:[%s5049_s1 + $0x40] sm:$0xff]  ;;  %v3512_v43 = vld [vmem:[%s5049_s1 + $0x48] sm:$0xff]  ;;  %v3610_v16 = vld [vmem:[%s5051_s3 + $0xb8] sm:$0xff] }
  0x16   : > { %4124 = vmatpush3.bf16.msra.mxu0 %v4121_v11  ;;  %v4167_v11 = vpack.c.bf16 %v3493_v9, %v3492_v8  ;;  %v3517_v48 = vld [vmem:[%s5050_s2 + $0x40] sm:$0xff]  ;;  %v3518_v49 = vld [vmem:[%s5050_s2 + $0x48] sm:$0xff] }
  0x17   : > { %s3629_s11 = sshll.u32 %s246_s26, 4  ;;  %4134 = vmatprep.subr.bf16.mxu0 %v4133_v25  ;;  %v4193_v52 = vpack.c.bf16 %v3518_v49, %v3517_v48  ;;  %s3465_s26 = sshll.u32 %s242_s20, 4 }
  0x18   : > { %s249_s14 = scalar_lea.vmem %s5048_s0, %s3629_s11  ;;  %s244_s9 = scalar_lea.vmem [#allocation2], %s3465_s26 }
  0x19   : > { %v4599_v12 = vld [vmem:[%s249_s14] sm:$0xff]  ;;  %v4605_v13 = vld [vmem:[%s249_s14 + $0x8] sm:$0xff]  ;;  %s3399_s10 = sshll.u32 %s244_s9, 4  ;;  %s3630_s11 = sshll.u32 %s4543_s25, 8  ;;  %s4998_s10 = int_to_ptr.vmem [resolvable:$true] %s3399_s10 }
  0x1a   : > { %3824 = vmatprep.mubr.msk.f32.mxu1 %vm256_vm0, %v4599_v12  ;;  %3813 = vmatprep.mubr.msk.f32.mxu0 %vm256_vm0, %v4599_v12  ;;  %s5003_s14 = scalar_lea.hbm %s5054_s6, %s3630_s11  ;;  %s4420_s25 = scalar_lea.vmem %s4998_s10, 256 }
  0x1b   : > { %3825 = vmatmul.mubr.msk.f32.vlgmr.msra.gmra.mrb[0].mxu1 %vm256_vm0, %v4605_v13  ;;  %3814 = vmatmul.mubr.msk.f32.vlgmr.msra.gmra.mrb[0].mxu0 %vm256_vm0, %v4605_v13  ;;  %p4421_p11 = scmp.ne.s32.totalorder %s4998_s10, %s4420_s25  ;;  %p4427_p0 = scmp.lt.s32.totalorder %s4998_s10, %s4425_s17 }
  0x1c   : > { %3835 = vmatprep.mubr.msk.f32.mxu0 %vm256_vm0, %v4599_v12  ;;  %4136 = vmatpush3.bf16.msra.mxu0 %v4133_v25  ;;  %p4428_p1 = scmp.lt.s32.totalorder %s4426_s18, %s4420_s25 }
  0x1d   : > { %4138 = vmatprep.subr.bf16.mxu0 %v4137_v27  ;;  %p4422_p12 = pnand %p4421_p11, %p4560_p5 }
  0x1e   : > { %p4429_p2 = por %p4428_p1, %p4427_p0 }
  0x1f   : > { %p4423_p13 = pneg %p4422_p12 }
  0x20   : > { %4140 = vmatpush3.bf16.msra.mxu0 %v4137_v27 }
  0x21   : > { %4160 = vmatprep.subr.bf16.mxu0 %v4159_v44  ;;  %p4430_p3 = pnand %p4429_p2, %p4423_p13 }
  0x23   : > { %3836 = vmatmul.mubr.msk.f32.vlgmr.msra.gmra.mrb[2].mxu0 %vm256_vm0, %v4605_v13 }
  0x24   : > { %3871 = vmatprep.mubr.msk.f32.mxu0 %vm256_vm0, %v4599_v12  ;;  %4162 = vmatpush3.bf16.msra.mxu0 %v4159_v44  ;;  %v4185_v44 = vpack.c.bf16 %v3512_v43, %v3511_v42  ;;  %v3548_v42 = vld [vmem:[%s5050_s2 + $0x78] sm:$0xff] }
  0x25   : > { %4164 = vmatprep.subr.bf16.mxu0 %v4163_v50 }
  0x28   : > { %4166 = vmatpush3.bf16.msra.mxu0 %v4163_v50 }
  0x2b   : > { %3872 = vmatmul.mubr.msk.f32.vlgmr.msra.gmra.mrb[4].mxu0 %vm256_vm0, %v4605_v13 }
  0xee   : > { %v3826_v14 = vpop.f32.mrb[0].mxu1  ;;  %v3815_v17 = vpop.f32.mrb[0].mxu0 }
  0xef   : > { %v410_v15 = vpop.f32.mrb[1].mxu1  ;;  %v329_v19 = vpop.f32.mrb[1].mxu0  ;;  %v339_v21 = vmul.f32 0.23570226, %v3815_v17 }
  0xf0   : > { %v4141_v18 = vpack.c.bf16 %v3826_v14, %v410_v15  ;;  %v338_v20 = vmul.f32 0.23570226, %v329_v19  ;;  %v3495_v14 = vld [vmem:[%s5051_s3 + $0x38] sm:$0xff] }
  0xf1   : > { %v4171_v15 = vpack.c.bf16 %v3495_v14, %v3494_v10 }
  0xf2   : > { %4143 = vmatprep.subr.msk.bf16.mxu1 %vm4615_vm2, %v4141_v18  ;;  %3842 = vmatprep.mubr.msk.f32.mxu1 %vm498_vm1, %v338_v20 }
  0xf3   : > { %4146 = vmatpush3.bf16.xpose.msk.msra.mxu1 %vm4615_vm2, %v4141_v18 }
  0xf6   : > { %v3837_v45 = vpop.f32.mrb[2].mxu0 }
  0xf7   : > { %v489_v46 = vpop.f32.mrb[3].mxu0 }
  0xf8   : > { %v4147_v47 = vpack.c.bf16 %v3837_v45, %v489_v46  ;;  %v3513_v45 = vld [vmem:[%s5049_s1 + $0x50] sm:$0xff]  ;;  %v3514_v46 = vld [vmem:[%s5049_s1 + $0x58] sm:$0xff] }
  0xfa   : > { %3843 = vmatmul.mubr.msk.f32.vlgmr.msra.gmra.mrb[2].mxu1 %vm498_vm1, %v339_v21  ;;  %4148 = vmatprep.subr.bf16.mxu1 %v4147_v47 }
  0xfb   : > { %4150 = vmatpush3.bf16.msra.mxu1 %v4147_v47  ;;  %v4189_v47 = vpack.c.bf16 %v3514_v46, %v3513_v45 }
  0xfc   : > { %4152 = vmatprep.subr.bf16.mxu1 %v4151_v53 }
  0xfe   : > { %v3873_v63 = vpop.f32.mrb[4].mxu0 }
  0xff   : > { %v844_v0 = vpop.f32.mrb[5].mxu0 }
 0x100   : > { %v4175_v1 = vpack.c.bf16 %v3873_v63, %v844_v0  ;;  %v3523_v63 = vld [vmem:[%s5051_s3 + $0x40] sm:$0xff]  ;;  %v3524_v0 = vld [vmem:[%s5051_s3 + $0x48] sm:$0xff] }
 0x102   : > { %4177 = vmatprep.subr.msk.bf16.mxu0 %vm4615_vm2, %v4175_v1 }
 0x103   : > { %4180 = vmatpush3.bf16.xpose.msk.msra.mxu0 %vm4615_vm2, %v4175_v1  ;;  %v3525_v1 = vld [vmem:[%s5051_s3 + $0x50] sm:$0xff] }
 0x1cd   : > { %v3844_v28 = vpop.f32.mrb[2].mxu1 }
 0x1ce   : > { %v577_v29 = vpop.f32.mrb[3].mxu1  ;;  %v590_v31 = vsel %vm586_vm3, %v3844_v28, -inf }
 0x1cf   : > { %v587_v30 = vsel %vm586_vm3, %v577_v29, -inf }
 0x1d0   : > { %588 = vmax.xlane.f32.xlu0 %v587_v30 }
 0x1d4   : > { %591 = vmax.xlane.f32.xlu0 %v590_v31 }
 0x25d   : > { %v589_v32 = vpop.xlane.xlu0 %588 }
 0x25e   : > { %v593_v33 = vsub.f32 %v577_v29, %v589_v32 }
 0x260   : > { %v595_v34 = vmul.f32 1.442695, %v593_v33 }
 0x261   : > { %v592_v35 = vpop.xlane.xlu0 %591 }
 0x262   : > { %4372 = vpow2.f32 %v595_v34  ;;  %v594_v36 = vsub.f32 %v3844_v28, %v592_v35  ;;  %v3504_v34 = vld [vmem:[%s5052_s4 + $0x4] sm:$0x7] }
 0x263   : > { %3899 = vmatprep.subr.msk.mxu0 %vm1131_vm4, %v3504_v34 }
 0x264   : > { %v597_v37 = vmul.f32 1.442695, %v594_v36 }
 0x266   : > { %4374 = vpow2.f32 %v597_v37 }
 0x26c   : > { %v4373_v38 = vpop.eup %4372 }
 0x26d   : > { %v599_v39 = vsel %vm586_vm3, %v4373_v38, 0.0 }
 0x26e   : > { %600 = vadd.xlane.f32.xlu1 %v599_v39 }
 0x270   : > { %v4375_v40 = vpop.eup %4374 }
 0x271   : > { %v602_v41 = vsel %vm586_vm3, %v4375_v40, 0.0 }
 0x272   : > { %603 = vadd.xlane.f32.xlu1 %v602_v41  ;;  %v690_v41 = vld [vmem:[%s5052_s4] sm:$0x7] }
 0x2fb   : > { %v601_v54 = vpop.xlane.xlu1 %600 }
 0x2fc   : > { %4376 = vrcp.f32 %v601_v54  ;;  %v3520_v54 = vld [vmem:[%s5050_s2 + $0x58] sm:$0xff] }
 0x2ff   : > { %v604_v55 = vpop.xlane.xlu1 %603 }
 0x300   : > { %4378 = vrcp.f32 %v604_v55 }
 0x306   : > { %v4377_v56 = vpop.eup %4376 }
 0x307   : > { %v607_v57 = vmul.f32 %v4377_v56, %v4373_v38 }
 0x309   : > { %3849 = vmatprep.mubr.msk.f32.mxu1 %vm586_vm3, %v607_v57 }
 0x30a   : > { %v4379_v60 = vpop.eup %4378 }
 0x30b   : > { %v608_v61 = vmul.f32 %v4379_v60, %v4375_v40 }
 0x30d   : > { %3850 = vmatmul.mubr.msk.f32.vlgmr.msra.gmra.mrb[4].mxu1 %vm586_vm3, %v608_v61 }
 0x30e   : > { %4154 = vmatpush3.bf16.msra.mxu1 %v4151_v53  ;;  %3860 = vmatprep.mubr.msk.f32.mxu1 %vm256_vm0, %v4599_v12  ;;  %v3519_v53 = vld [vmem:[%s5050_s2 + $0x50] sm:$0xff] }
 0x30f   : > { %4156 = vmatprep.subr.bf16.mxu1 %v4155_v62  ;;  %v4197_v55 = vpack.c.bf16 %v3520_v54, %v3519_v53  ;;  %v3551_v53 = vld [vmem:[%s5051_s3 + $0x60] sm:$0xff]  ;;  %v3552_v54 = vld [vmem:[%s5051_s3 + $0x68] sm:$0xff] }
 0x312   : > { %4158 = vmatpush3.bf16.msra.mxu1 %v4155_v62 }
 0x313   : > { %4168 = vmatprep.subr.bf16.mxu1 %v4167_v11 }
 0x315   : > { %3861 = vmatmul.mubr.msk.f32.vlgmr.msra.gmra.mrb[6].mxu1 %vm256_vm0, %v4605_v13 }
 0x316   : > { %3882 = vmatprep.mubr.msk.f32.mxu1 %vm256_vm0, %v4599_v12  ;;  %4170 = vmatpush3.bf16.msra.mxu1 %v4167_v11 }
 0x317   : > { %4172 = vmatprep.subr.bf16.mxu1 %v4171_v15 }
 0x31a   : > { %4174 = vmatpush3.bf16.msra.mxu1 %v4171_v15 }
 0x31d   : > { %3883 = vmatmul.mubr.msk.f32.vlgmr.msra.gmra.mrb[8].mxu1 %vm256_vm0, %v4605_v13 }
 0x3e0   : > { %v4683_v2 = vpop.f32.mrb[4].mxu1 }
 0x3e1   : > { %v4685_v3 = vpop.f32.mrb[5].mxu1 }
 0x3e8   : > { %v3862_v4 = vpop.f32.mrb[6].mxu1 }
 0x3e9   : > { %v762_v5 = vpop.f32.mrb[7].mxu1  ;;  %v772_v7 = vmul.f32 0.23570226, %v3862_v4 }
 0x3ea   : > { %v771_v6 = vmul.f32 0.23570226, %v762_v5 }
 0x3ec   : > { %3889 = vmatprep.mubr.msk.f32.mxu0 %vm498_vm1, %v771_v6 }
 0x3ed   : > { %3890 = vmatmul.mubr.msk.f32.vlgmr.msra.gmra.mrb[6].mxu0 %vm498_vm1, %v772_v7 }
 0x3ee   : > { %3900 = vmatpush3.msk.msra.mxu0 %vm1131_vm4, %v3504_v34 }
 0x3ef   : > { %3904 = vmatprep.subr.msk.mxu0 %vm1131_vm4, %v690_v41 }
 0x3f0   : > { %v3884_v31 = vpop.f32.mrb[8].mxu1 }
 0x3f1   : > { %v924_v32 = vpop.f32.mrb[9].mxu1 }
 0x3f2   : > { %v4181_v33 = vpack.c.bf16 %v3884_v31, %v924_v32  ;;  %v3545_v32 = vld [vmem:[%s5050_s2 + $0x60] sm:$0xff] }
 0x3f4   : > { %4182 = vmatprep.subr.bf16.mxu1 %v4181_v33 }
 0x3f5   : > { %4184 = vmatpush3.bf16.msra.mxu1 %v4181_v33  ;;  %v3546_v33 = vld [vmem:[%s5050_s2 + $0x68] sm:$0xff] }
 0x3f6   : > { %4186 = vmatprep.subr.bf16.mxu1 %v4185_v44  ;;  %v4227_v34 = vpack.c.bf16 %v3546_v33, %v3545_v32  ;;  %v3576_v32 = vld [vmem:[%s5050_s2 + $0x98] sm:$0xff] }
 0x4c0   : > { %v3891_v17 = vpop.f32.mrb[6].mxu0 }
 0x4c1   : > { %v1011_v18 = vpop.f32.mrb[7].mxu0  ;;  %v1023_v19 = vsel %vm586_vm3, %v3891_v17, -inf }
 0x4c2   : > { %1024 = vmax.xlane.f32.xlu1 %v1023_v19  ;;  %v1020_v20 = vsel %vm586_vm3, %v1011_v18, -inf }
 0x4c3   : > { %1021 = vmax.xlane.f32.xlu0 %v1020_v20 }
 0x54f   : > { %v1025_v21 = vpop.xlane.xlu1 %1024 }
 0x550   : > { %v1027_v22 = vsub.f32 %v3891_v17, %v1025_v21  ;;  %v1022_v23 = vpop.xlane.xlu0 %1021 }
 0x551   : > { %v1026_v24 = vsub.f32 %v1011_v18, %v1022_v23 }
 0x552   : > { %v1030_v25 = vmul.f32 1.442695, %v1027_v22 }
 0x553   : > { %v1028_v26 = vmul.f32 1.442695, %v1026_v24 }
 0x554   : > { %4380 = vpow2.f32 %v1030_v25  ;;  %v3535_v25 = vld [vmem:[%s5052_s4 + $0x8] sm:$0x7] }
 0x555   : > { %4382 = vpow2.f32 %v1028_v26 }
 0x55e   : > { %v4381_v27 = vpop.eup %4380 }
 0x55f   : > { %v4383_v28 = vpop.eup %4382  ;;  %v1035_v29 = vsel %vm586_vm3, %v4381_v27, 0.0 }
 0x560   : > { %1036 = vadd.xlane.f32.xlu1 %v1035_v29  ;;  %v1032_v30 = vsel %vm586_vm3, %v4383_v28, 0.0 }
 0x561   : > { %1033 = vadd.xlane.f32.xlu0 %v1032_v30 }
 0x5ed   : > { %v1037_v35 = vpop.xlane.xlu1 %1036 }
 0x5ee   : > { %4384 = vrcp.f32 %v1037_v35  ;;  %v1034_v36 = vpop.xlane.xlu0 %1033  ;;  %v3539_v35 = vld [vmem:[%s5049_s1 + $0x60] sm:$0xff] }
 0x5ef   : > { %4386 = vrcp.f32 %v1034_v36  ;;  %v3540_v36 = vld [vmem:[%s5049_s1 + $0x68] sm:$0xff] }
 0x5f8   : > { %v4385_v37 = vpop.eup %4384 }
 0x5f9   : > { %v4387_v38 = vpop.eup %4386  ;;  %v1041_v40 = vmul.f32 %v4385_v37, %v4381_v27  ;;  %v4219_v37 = vpack.c.bf16 %v3540_v36, %v3539_v35 }
 0x5fa   : > { %v1040_v39 = vmul.f32 %v4387_v38, %v4383_v28  ;;  %v3541_v38 = vld [vmem:[%s5049_s1 + $0x70] sm:$0xff] }
 0x5fc   : > { %3896 = vmatprep.mubr.msk.f32.mxu1 %vm586_vm3, %v1040_v39  ;;  %v3542_v39 = vld [vmem:[%s5049_s1 + $0x78] sm:$0xff] }
 0x5fd   : > { %3897 = vmatmul.mubr.msk.f32.vlgmr.msra.gmra.mrb[10].mxu1 %vm586_vm3, %v1041_v40  ;;  %v4223_v40 = vpack.c.bf16 %v3542_v39, %v3541_v38 }
 0x5fe   : > { %3917 = vmatprep.mubr.msk.f32.mxu1 %vm256_vm0, %v4599_v12  ;;  %4188 = vmatpush3.bf16.msra.mxu1 %v4185_v44 }
 0x5ff   : > { %4190 = vmatprep.subr.bf16.mxu1 %v4189_v47 }
 0x602   : > { %4192 = vmatpush3.bf16.msra.mxu1 %v4189_v47 }
 0x605   : > { %3918 = vmatmul.mubr.msk.f32.vlgmr.msra.gmra.mrb[12].mxu1 %vm256_vm0, %v4605_v13 }
 0x606   : > { %3939 = vmatprep.mubr.msk.f32.mxu1 %vm256_vm0, %v4599_v12 }
 0x6d0   : > { %v3898_v50 = vpop.f32.mrb[10].mxu1 }
 0x6d1   : > { %v1114_v51 = vpop.f32.mrb[11].mxu1 }
 0x6d2   : > { %3901 = vmatprep.mubr.msk.f32.mxu0 %vm498_vm1, %v1114_v51 }
 0x6d3   : > { %3902 = vmatmul.mubr.msk.f32.vlgmr.msra.gmra.mrb[8].mxu0 %vm498_vm1, %v3898_v50 }
 0x6d4   : > { %3905 = vmatpush3.msk.msra.mxu0 %vm1131_vm4, %v690_v41  ;;  %3906 = vmatprep.mubr.msk.f32.mxu0 %vm498_vm1, %v4685_v3  ;;  %v3526_v3 = vld [vmem:[%s5051_s3 + $0x58] sm:$0xff]  ;;  %v3547_v41 = vld [vmem:[%s5050_s2 + $0x70] sm:$0xff] }
 0x6d5   : > { %4194 = vmatprep.subr.bf16.mxu0 %v4193_v52  ;;  %v4205_v4 = vpack.c.bf16 %v3526_v3, %v3525_v1  ;;  %v4231_v45 = vpack.c.bf16 %v3548_v42, %v3547_v41 }
 0x6d8   : > { %v3919_v56 = vpop.f32.mrb[12].mxu1 }
 0x6d9   : > { %v1365_v57 = vpop.f32.mrb[13].mxu1  ;;  %v1375_v62 = vmul.f32 0.23570226, %v3919_v56  ;;  %v4235_v56 = vpack.c.bf16 %v3552_v54, %v3551_v53 }
 0x6da   : > { %v1374_v58 = vmul.f32 0.23570226, %v1365_v57  ;;  %v3554_v57 = vld [vmem:[%s5051_s3 + $0x78] sm:$0xff] }
 0x6db   : > { %3907 = vmatmul.mubr.msk.f32.vlgmr.msra.gmra.mrb[8].mxu0 %vm498_vm1, %v4683_v2  ;;  %v4201_v2 = vpack.c.bf16 %v3524_v0, %v3523_v63 }
 0x6dc   : > { %4196 = vmatpush3.bf16.msra.mxu0 %v4193_v52  ;;  %3928 = vmatprep.mubr.msk.f32.mxu0 %vm256_vm0, %v4599_v12 }
 0x6dd   : > { %4198 = vmatprep.subr.bf16.mxu0 %v4197_v55  ;;  %4202 = vmatprep.subr.bf16.mxu1 %v4201_v2 }
 0x6de   : > { %4204 = vmatpush3.bf16.msra.mxu1 %v4201_v2 }
 0x6df   : > { %4206 = vmatprep.subr.bf16.mxu1 %v4205_v4 }
 0x6e0   : > { %4200 = vmatpush3.bf16.msra.mxu0 %v4197_v55  ;;  %v3553_v55 = vld [vmem:[%s5051_s3 + $0x70] sm:$0xff] }
 0x6e2   : > { %4208 = vmatpush3.bf16.msra.mxu1 %v4205_v4 }
 0x6e3   : > { %3929 = vmatmul.mubr.msk.f32.vlgmr.msra.gmra.mrb[10].mxu0 %vm256_vm0, %v4605_v13 }
 0x6e4   : > { %3946 = vmatprep.mubr.msk.f32.mxu0 %vm498_vm1, %v1374_v58  ;;  %v4239_v58 = vpack.c.bf16 %v3554_v57, %v3553_v55 }
 0x6e5   : > { %3940 = vmatmul.mubr.msk.f32.vlgmr.msra.gmra.mrb[14].mxu1 %vm256_vm0, %v4605_v13 }
 0x7b6   : > { %v3930_v59 = vpop.f32.mrb[10].mxu0 }
 0x7b7   : > { %v1447_v60 = vpop.f32.mrb[11].mxu0 }
 0x7b8   : > { %v4209_v61 = vpack.c.bf16 %v3930_v59, %v1447_v60  ;;  %v3941_v22 = vpop.f32.mrb[14].mxu1 }
 0x7b9   : > { %v1527_v23 = vpop.f32.mrb[15].mxu1 }
 0x7ba   : > { %4211 = vmatprep.subr.msk.bf16.mxu0 %vm4615_vm2, %v4209_v61  ;;  %v4215_v24 = vpack.c.bf16 %v3941_v22, %v1527_v23  ;;  %v3573_v22 = vld [vmem:[%s5050_s2 + $0x80] sm:$0xff]  ;;  %v3574_v23 = vld [vmem:[%s5050_s2 + $0x88] sm:$0xff] }
 0x7bb   : > { %4214 = vmatpush3.bf16.xpose.msk.msra.mxu0 %vm4615_vm2, %v4209_v61 }
 0x7bc   : > { %4216 = vmatprep.subr.bf16.mxu1 %v4215_v24  ;;  %3956 = vmatprep.subr.msk.mxu0 %vm1131_vm4, %v3535_v25 }
 0x7bd   : > { %4218 = vmatpush3.bf16.msra.mxu1 %v4215_v24  ;;  %v4261_v24 = vpack.c.bf16 %v3574_v23, %v3573_v22  ;;  %v3604_v22 = vld [vmem:[%s5050_s2 + $0xb8] sm:$0xff] }
 0x7be   : > { %4220 = vmatprep.subr.bf16.mxu1 %v4219_v37 }
 0x7c2   : > { %3947 = vmatmul.mubr.msk.f32.vlgmr.msra.gmra.mrb[12].mxu0 %vm498_vm1, %v1375_v62 }
 0x7c3   : > { %3957 = vmatpush3.msk.msra.mxu0 %vm1131_vm4, %v3535_v25  ;;  %v3567_v25 = vld [vmem:[%s5049_s1 + $0x80] sm:$0xff] }
 0x7c4   : > { %4228 = vmatprep.subr.bf16.mxu0 %v4227_v34 }
 0x895   : > { %v3948_v5 = vpop.f32.mrb[12].mxu0 }
 0x896   : > { %v1614_v6 = vpop.f32.mrb[13].mxu0  ;;  %v1626_v7 = vsel %vm586_vm3, %v3948_v5, -inf }
 0x897   : > { %1627 = vmax.xlane.f32.xlu1 %v1626_v7  ;;  %v1623_v8 = vsel %vm586_vm3, %v1614_v6, -inf }
 0x898   : > { %1624 = vmax.xlane.f32.xlu0 %v1623_v8 }
 0x924   : > { %v1628_v9 = vpop.xlane.xlu1 %1627 }
 0x925   : > { %v1630_v10 = vsub.f32 %v3948_v5, %v1628_v9  ;;  %v1625_v11 = vpop.xlane.xlu0 %1624 }
 0x926   : > { %v1629_v14 = vsub.f32 %v1614_v6, %v1625_v11 }
 0x927   : > { %v1633_v15 = vmul.f32 1.442695, %v1630_v10 }
 0x928   : > { %v1631_v17 = vmul.f32 1.442695, %v1629_v14  ;;  %v3563_v14 = vld [vmem:[%s5052_s4 + $0xc] sm:$0x7] }
 0x929   : > { %4388 = vpow2.f32 %v1633_v15 }
 0x92a   : > { %4390 = vpow2.f32 %v1631_v17 }
 0x933   : > { %v4389_v18 = vpop.eup %4388 }
 0x934   : > { %v4391_v19 = vpop.eup %4390  ;;  %v1638_v20 = vsel %vm586_vm3, %v4389_v18, 0.0 }
 0x935   : > { %1639 = vadd.xlane.f32.xlu1 %v1638_v20  ;;  %v1635_v21 = vsel %vm586_vm3, %v4391_v19, 0.0 }
 0x936   : > { %1636 = vadd.xlane.f32.xlu0 %v1635_v21 }
 0x9c2   : > { %v1640_v26 = vpop.xlane.xlu1 %1639 }
 0x9c3   : > { %4392 = vrcp.f32 %v1640_v26  ;;  %v1637_v27 = vpop.xlane.xlu0 %1636  ;;  %v3568_v26 = vld [vmem:[%s5049_s1 + $0x88] sm:$0xff] }
 0x9c4   : > { %4394 = vrcp.f32 %v1637_v27  ;;  %v4253_v27 = vpack.c.bf16 %v3568_v26, %v3567_v25 }
 0x9cd   : > { %v4393_v28 = vpop.eup %4392 }
 0x9ce   : > { %v4395_v29 = vpop.eup %4394  ;;  %v1644_v31 = vmul.f32 %v4393_v28, %v4389_v18  ;;  %v3569_v28 = vld [vmem:[%s5049_s1 + $0x90] sm:$0xff] }
 0x9cf   : > { %v1643_v30 = vmul.f32 %v4395_v29, %v4391_v19  ;;  %v3570_v29 = vld [vmem:[%s5049_s1 + $0x98] sm:$0xff] }
 0x9d1   : > { %3953 = vmatprep.mubr.msk.f32.mxu1 %vm586_vm3, %v1643_v30  ;;  %v4257_v30 = vpack.c.bf16 %v3570_v29, %v3569_v28 }
 0x9d2   : > { %3954 = vmatmul.mubr.msk.f32.vlgmr.msra.gmra.mrb[16].mxu1 %vm586_vm3, %v1644_v31  ;;  %v3575_v31 = vld [vmem:[%s5050_s2 + $0x90] sm:$0xff] }
 0x9d3   : > { %3969 = vmatprep.mubr.msk.f32.mxu1 %vm256_vm0, %v4599_v12  ;;  %4222 = vmatpush3.bf16.msra.mxu1 %v4219_v37  ;;  %v4265_v35 = vpack.c.bf16 %v3576_v32, %v3575_v31  ;;  %v3607_v32 = vld [vmem:[%s5051_s3 + $0xa0] sm:$0xff] }
 0x9d4   : > { %4224 = vmatprep.subr.bf16.mxu1 %v4223_v40 }
 0x9d7   : > { %4226 = vmatpush3.bf16.msra.mxu1 %v4223_v40 }
 0x9d8   : > { %4236 = vmatprep.subr.bf16.mxu1 %v4235_v56 }
 0x9da   : > { %3970 = vmatmul.mubr.msk.f32.vlgmr.msra.gmra.mrb[18].mxu1 %vm256_vm0, %v4605_v13 }
 0x9db   : > { %3991 = vmatprep.mubr.msk.f32.mxu1 %vm256_vm0, %v4599_v12  ;;  %4238 = vmatpush3.bf16.msra.mxu1 %v4235_v56 }
 0x9dc   : > { %4240 = vmatprep.subr.bf16.mxu1 %v4239_v58 }
 0x9df   : > { %4242 = vmatpush3.bf16.msra.mxu1 %v4239_v58 }
 0x9e2   : > { %3992 = vmatmul.mubr.msk.f32.vlgmr.msra.gmra.mrb[20].mxu1 %vm256_vm0, %v4605_v13 }
 0xaa5   : > { %v3955_v43 = vpop.f32.mrb[16].mxu1 }
 0xaa6   : > { %v1717_v44 = vpop.f32.mrb[17].mxu1 }
 0xaa7   : > { %3958 = vmatprep.mubr.msk.f32.mxu0 %vm498_vm1, %v1717_v44  ;;  %v3580_v44 = vld [vmem:[%s5051_s3 + $0x88] sm:$0xff] }
 0xaa8   : > { %3959 = vmatmul.mubr.msk.f32.vlgmr.msra.gmra.mrb[8].mxu0 %vm498_vm1, %v3955_v43  ;;  %v3579_v43 = vld [vmem:[%s5051_s3 + $0x80] sm:$0xff] }
 0xaa9   : > { %4230 = vmatpush3.bf16.msra.mxu0 %v4227_v34  ;;  %3980 = vmatprep.mubr.msk.f32.mxu0 %vm256_vm0, %v4599_v12 }
 0xaaa   : > { %4232 = vmatprep.subr.bf16.mxu0 %v4231_v45 }
 0xaad   : > { %4234 = vmatpush3.bf16.msra.mxu0 %v4231_v45  ;;  %v3971_v46 = vpop.f32.mrb[18].mxu1  ;;  %v3581_v45 = vld [vmem:[%s5051_s3 + $0x90] sm:$0xff] }
 0xaae   : > { %v1885_v47 = vpop.f32.mrb[19].mxu1  ;;  %v1895_v52 = vmul.f32 0.23570226, %v3971_v46  ;;  %v4269_v46 = vpack.c.bf16 %v3580_v44, %v3579_v43 }
 0xaaf   : > { %v1894_v48 = vmul.f32 0.23570226, %v1885_v47  ;;  %v3582_v47 = vld [vmem:[%s5051_s3 + $0x98] sm:$0xff] }
 0xab0   : > { %3981 = vmatmul.mubr.msk.f32.vlgmr.msra.gmra.mrb[14].mxu0 %vm256_vm0, %v4605_v13 }
 0xab1   : > { %3998 = vmatprep.mubr.msk.f32.mxu0 %vm498_vm1, %v1894_v48  ;;  %v4273_v48 = vpack.c.bf16 %v3582_v47, %v3581_v45 }
 0xab5   : > { %v3993_v9 = vpop.f32.mrb[20].mxu1 }
 0xab6   : > { %v2047_v10 = vpop.f32.mrb[21].mxu1 }
 0xab7   : > { %v4249_v11 = vpack.c.bf16 %v3993_v9, %v2047_v10  ;;  %v3601_v9 = vld [vmem:[%s5050_s2 + $0xa0] sm:$0xff]  ;;  %v3602_v10 = vld [vmem:[%s5050_s2 + $0xa8] sm:$0xff] }
 0xab9   : > { %4250 = vmatprep.subr.bf16.mxu1 %v4249_v11 }
 0xaba   : > { %4252 = vmatpush3.bf16.msra.mxu1 %v4249_v11  ;;  %v4295_v11 = vpack.c.bf16 %v3602_v10, %v3601_v9 }
 0xabb   : > { %4254 = vmatprep.subr.bf16.mxu1 %v4253_v27 }
 0xb83   : > { %v3982_v49 = vpop.f32.mrb[14].mxu0 }
 0xb84   : > { %v1967_v50 = vpop.f32.mrb[15].mxu0 }
 0xb85   : > { %v4243_v51 = vpack.c.bf16 %v3982_v49, %v1967_v50 }
 0xb87   : > { %4245 = vmatprep.subr.msk.bf16.mxu0 %vm4615_vm2, %v4243_v51 }
 0xb88   : > { %4248 = vmatpush3.bf16.xpose.msk.msra.mxu0 %vm4615_vm2, %v4243_v51 }
 0xb89   : > { %4008 = vmatprep.subr.msk.mxu0 %vm1131_vm4, %v3563_v14 }
 0xb8f   : > { %3999 = vmatmul.mubr.msk.f32.vlgmr.msra.gmra.mrb[16].mxu0 %vm498_vm1, %v1895_v52 }
 0xb90   : > { %4009 = vmatpush3.msk.msra.mxu0 %vm1131_vm4, %v3563_v14  ;;  %v3595_v14 = vld [vmem:[%s5049_s1 + $0xa0] sm:$0xff] }
 0xb91   : > { %4262 = vmatprep.subr.bf16.mxu0 %v4261_v24 }
 0xc62   : > { %v4000_v59 = vpop.f32.mrb[16].mxu0 }
 0xc63   : > { %v2134_v60 = vpop.f32.mrb[17].mxu0  ;;  %v2146_v61 = vsel %vm586_vm3, %v4000_v59, -inf }
 0xc64   : > { %2147 = vmax.xlane.f32.xlu1 %v2146_v61  ;;  %v2143_v62 = vsel %vm586_vm3, %v2134_v60, -inf }
 0xc65   : > { %2144 = vmax.xlane.f32.xlu0 %v2143_v62 }
 0xcf1   : > { %v2148_v63 = vpop.xlane.xlu1 %2147 }
 0xcf2   : > { %v2150_v0 = vsub.f32 %v4000_v59, %v2148_v63  ;;  %v2145_v1 = vpop.xlane.xlu0 %2144 }
 0xcf3   : > { %v2149_v2 = vsub.f32 %v2134_v60, %v2145_v1 }
 0xcf4   : > { %v2153_v3 = vmul.f32 1.442695, %v2150_v0 }
 0xcf5   : > { %v2151_v4 = vmul.f32 1.442695, %v2149_v2  ;;  %v3591_v2 = vld [vmem:[%s5052_s4 + $0x10] sm:$0x7] }
 0xcf6   : > { %4396 = vpow2.f32 %v2153_v3 }
 0xcf7   : > { %4398 = vpow2.f32 %v2151_v4 }
 0xd00   : > { %v4397_v5 = vpop.eup %4396 }
 0xd01   : > { %v4399_v6 = vpop.eup %4398  ;;  %v2158_v7 = vsel %vm586_vm3, %v4397_v5, 0.0 }
 0xd02   : > { %2159 = vadd.xlane.f32.xlu1 %v2158_v7  ;;  %v2155_v8 = vsel %vm586_vm3, %v4399_v6, 0.0 }
 0xd03   : > { %2156 = vadd.xlane.f32.xlu0 %v2155_v8 }
 0xd8f   : > { %v2160_v15 = vpop.xlane.xlu1 %2159 }
 0xd90   : > { %4400 = vrcp.f32 %v2160_v15  ;;  %v2157_v17 = vpop.xlane.xlu0 %2156  ;;  %v3596_v15 = vld [vmem:[%s5049_s1 + $0xa8] sm:$0xff] }
 0xd91   : > { %4402 = vrcp.f32 %v2157_v17  ;;  %v4287_v17 = vpack.c.bf16 %v3596_v15, %v3595_v14 }
 0xd9a   : > { %v4401_v18 = vpop.eup %4400 }
 0xd9b   : > { %v4403_v19 = vpop.eup %4402  ;;  %v2164_v21 = vmul.f32 %v4401_v18, %v4397_v5  ;;  %v3597_v18 = vld [vmem:[%s5049_s1 + $0xb0] sm:$0xff] }
 0xd9c   : > { %v2163_v20 = vmul.f32 %v4403_v19, %v4399_v6  ;;  %v3598_v19 = vld [vmem:[%s5049_s1 + $0xb8] sm:$0xff] }
 0xd9e   : > { %4005 = vmatprep.mubr.msk.f32.mxu1 %vm586_vm3, %v2163_v20  ;;  %v4291_v20 = vpack.c.bf16 %v3598_v19, %v3597_v18 }
 0xd9f   : > { %4006 = vmatmul.mubr.msk.f32.vlgmr.msra.gmra.mrb[22].mxu1 %vm586_vm3, %v2164_v21  ;;  %v3603_v21 = vld [vmem:[%s5050_s2 + $0xb0] sm:$0xff] }
 0xda0   : > { %4021 = vmatprep.mubr.msk.f32.mxu1 %vm256_vm0, %v4599_v12  ;;  %4256 = vmatpush3.bf16.msra.mxu1 %v4253_v27  ;;  %v4299_v25 = vpack.c.bf16 %v3604_v22, %v3603_v21 }
 0xda1   : > { %4258 = vmatprep.subr.bf16.mxu1 %v4257_v30 }
 0xda4   : > { %4260 = vmatpush3.bf16.msra.mxu1 %v4257_v30 }
 0xda5   : > { %4270 = vmatprep.subr.bf16.mxu1 %v4269_v46 }
 0xda7   : > { %4022 = vmatmul.mubr.msk.f32.vlgmr.msra.gmra.mrb[24].mxu1 %vm256_vm0, %v4605_v13 }
 0xda8   : > { %4043 = vmatprep.mubr.msk.f32.mxu1 %vm256_vm0, %v4599_v12  ;;  %4272 = vmatpush3.bf16.msra.mxu1 %v4269_v46 }
 0xda9   : > { %4274 = vmatprep.subr.bf16.mxu1 %v4273_v48 }
 0xdac   : > { %4276 = vmatpush3.bf16.msra.mxu1 %v4273_v48 }
 0xdaf   : > { %4044 = vmatmul.mubr.msk.f32.vlgmr.msra.gmra.mrb[26].mxu1 %vm256_vm0, %v4605_v13 }
 0xe72   : > { %v4007_v33 = vpop.f32.mrb[22].mxu1 }
 0xe73   : > { %v2237_v34 = vpop.f32.mrb[23].mxu1 }
 0xe74   : > { %4010 = vmatprep.mubr.msk.f32.mxu0 %vm498_vm1, %v2237_v34  ;;  %v3609_v34 = vld [vmem:[%s5051_s3 + $0xb0] sm:$0xff] }
 0xe75   : > { %4011 = vmatmul.mubr.msk.f32.vlgmr.msra.gmra.mrb[8].mxu0 %vm498_vm1, %v4007_v33  ;;  %v3608_v33 = vld [vmem:[%s5051_s3 + $0xa8] sm:$0xff] }
 0xe76   : > { %4264 = vmatpush3.bf16.msra.mxu0 %v4261_v24  ;;  %4032 = vmatprep.mubr.msk.f32.mxu0 %vm256_vm0, %v4599_v12 }
 0xe77   : > { %4266 = vmatprep.subr.bf16.mxu0 %v4265_v35 }
 0xe7a   : > { %4268 = vmatpush3.bf16.msra.mxu0 %v4265_v35  ;;  %v4023_v36 = vpop.f32.mrb[24].mxu1  ;;  %v4303_v35 = vpack.c.bf16 %v3608_v33, %v3607_v32 }
 0xe7b   : > { %v2405_v37 = vpop.f32.mrb[25].mxu1  ;;  %v2415_v42 = vmul.f32 0.23570226, %v4023_v36  ;;  %v4307_v36 = vpack.c.bf16 %v3610_v16, %v3609_v34 }
 0xe7c   : > { %v2414_v38 = vmul.f32 0.23570226, %v2405_v37 }
 0xe7d   : > { %4033 = vmatmul.mubr.msk.f32.vlgmr.msra.gmra.mrb[18].mxu0 %vm256_vm0, %v4605_v13 }
 0xe7e   : > { %4050 = vmatprep.mubr.msk.f32.mxu0 %vm498_vm1, %v2414_v38 }
 0xe82   : > { %v4045_v63 = vpop.f32.mrb[26].mxu1 }
 0xe83   : > { %v2567_v0 = vpop.f32.mrb[27].mxu1 }
 0xe84   : > { %v4283_v1 = vpack.c.bf16 %v4045_v63, %v2567_v0 }
 0xe86   : > { %4284 = vmatprep.subr.bf16.mxu1 %v4283_v1 }
 0xe87   : > { %4286 = vmatpush3.bf16.msra.mxu1 %v4283_v1 }
 0xe88   : > { %4288 = vmatprep.subr.bf16.mxu1 %v4287_v17 }
 0xf50   : > { %v4034_v39 = vpop.f32.mrb[18].mxu0 }
 0xf51   : > { %v2487_v40 = vpop.f32.mrb[19].mxu0 }
 0xf52   : > { %v4277_v41 = vpack.c.bf16 %v4034_v39, %v2487_v40 }
 0xf54   : > { %4279 = vmatprep.subr.msk.bf16.mxu0 %vm4615_vm2, %v4277_v41 }
 0xf55   : > { %4282 = vmatpush3.bf16.xpose.msk.msra.mxu0 %vm4615_vm2, %v4277_v41 }
 0xf56   : > { %4060 = vmatprep.subr.msk.mxu0 %vm1131_vm4, %v3591_v2 }
 0xf5c   : > { %4051 = vmatmul.mubr.msk.f32.vlgmr.msra.gmra.mrb[20].mxu0 %vm498_vm1, %v2415_v42 }
 0xf5d   : > { %4061 = vmatpush3.msk.msra.mxu0 %vm1131_vm4, %v3591_v2 }
 0xf5e   : > { %4296 = vmatprep.subr.bf16.mxu0 %v4295_v11 }
0x102f   : > { %v4052_v49 = vpop.f32.mrb[20].mxu0 }
0x1030   : > { %v2654_v50 = vpop.f32.mrb[21].mxu0  ;;  %v2666_v51 = vsel %vm586_vm3, %v4052_v49, -inf }
0x1031   : > { %2667 = vmax.xlane.f32.xlu1 %v2666_v51  ;;  %v2663_v52 = vsel %vm586_vm3, %v2654_v50, -inf }
0x1032   : > { %2664 = vmax.xlane.f32.xlu0 %v2663_v52 }
0x10be   : > { %v2668_v53 = vpop.xlane.xlu1 %2667 }
0x10bf   : > { %v2670_v54 = vsub.f32 %v4052_v49, %v2668_v53  ;;  %v2665_v55 = vpop.xlane.xlu0 %2664  ;;  %v3619_v53 = vld [vmem:[%s5052_s4 + $0x14] sm:$0x7] }
0x10c0   : > { %v2669_v56 = vsub.f32 %v2654_v50, %v2665_v55 }
0x10c1   : > { %v2673_v57 = vmul.f32 1.442695, %v2670_v54 }
0x10c2   : > { %v2671_v58 = vmul.f32 1.442695, %v2669_v56 }
0x10c3   : > { %4404 = vpow2.f32 %v2673_v57 }
0x10c4   : > { %4406 = vpow2.f32 %v2671_v58 }
0x10cd   : > { %v4405_v59 = vpop.eup %4404 }
0x10ce   : > { %v4407_v60 = vpop.eup %4406  ;;  %v2678_v61 = vsel %vm586_vm3, %v4405_v59, 0.0 }
0x10cf   : > { %2679 = vadd.xlane.f32.xlu1 %v2678_v61  ;;  %v2675_v62 = vsel %vm586_vm3, %v4407_v60, 0.0 }
0x10d0   : > { %2676 = vadd.xlane.f32.xlu0 %v2675_v62  ;;  %v3623_v62 = vld [vmem:[%s5053_s5] ss:$0 sm:$0xff] }
0x115c   : > { %v2680_v3 = vpop.xlane.xlu1 %2679 }
0x115d   : > { %4408 = vrcp.f32 %v2680_v3  ;;  %v2677_v4 = vpop.xlane.xlu0 %2676 }
0x115e   : > { %4410 = vrcp.f32 %v2677_v4 }
0x1167   : > { %v4409_v5 = vpop.eup %4408 }
0x1168   : > { %v4411_v6 = vpop.eup %4410  ;;  %v2684_v8 = vmul.f32 %v4409_v5, %v4405_v59 }
0x1169   : > { %v2683_v7 = vmul.f32 %v4411_v6, %v4407_v60 }
0x116b   : > { %4057 = vmatprep.mubr.msk.f32.mxu1 %vm586_vm3, %v2683_v7 }
0x116c   : > { %4058 = vmatmul.mubr.msk.f32.vlgmr.msra.gmra.mrb[28].mxu1 %vm586_vm3, %v2684_v8 }
0x116d   : > { %4073 = vmatprep.mubr.msk.f32.mxu1 %vm256_vm0, %v4599_v12  ;;  %4290 = vmatpush3.bf16.msra.mxu1 %v4287_v17 }
0x116e   : > { %4292 = vmatprep.subr.bf16.mxu1 %v4291_v20 }
0x1171   : > { %4294 = vmatpush3.bf16.msra.mxu1 %v4291_v20 }
0x1172   : > { %4304 = vmatprep.subr.bf16.mxu1 %v4303_v35 }
0x1174   : > { %4074 = vmatmul.mubr.msk.f32.vlgmr.msra.gmra.mrb[30].mxu1 %vm256_vm0, %v4605_v13 }
0x1175   : > { %4095 = vmatprep.mubr.msk.f32.mxu1 %vm256_vm0, %v4599_v12  ;;  %4306 = vmatpush3.bf16.msra.mxu1 %v4303_v35 }
0x1176   : > { %4308 = vmatprep.subr.bf16.mxu1 %v4307_v36 }
0x1179   : > { %4310 = vmatpush3.bf16.msra.mxu1 %v4307_v36 }
0x117c   : > { %4096 = vmatmul.mubr.msk.f32.vlgmr.msra.gmra.mrb[32].mxu1 %vm256_vm0, %v4605_v13 }
0x123f   : > { %v4059_v23 = vpop.f32.mrb[28].mxu1 }
0x1240   : > { %v2757_v24 = vpop.f32.mrb[29].mxu1 }
0x1241   : > { %4062 = vmatprep.mubr.msk.f32.mxu0 %vm498_vm1, %v2757_v24 }
0x1242   : > { %4063 = vmatmul.mubr.msk.f32.vlgmr.msra.gmra.mrb[8].mxu0 %vm498_vm1, %v4059_v23 }
0x1243   : > { %4298 = vmatpush3.bf16.msra.mxu0 %v4295_v11  ;;  %4084 = vmatprep.mubr.msk.f32.mxu0 %vm256_vm0, %v4599_v12 }
0x1244   : > { %4300 = vmatprep.subr.bf16.mxu0 %v4299_v25 }
0x1247   : > { %4302 = vmatpush3.bf16.msra.mxu0 %v4299_v25  ;;  %v4075_v26 = vpop.f32.mrb[30].mxu1 }
0x1248   : > { %v2925_v27 = vpop.f32.mrb[31].mxu1  ;;  %v2935_v12 = vmul.f32 0.23570226, %v4075_v26 }
0x1249   : > { %v2934_v28 = vmul.f32 0.23570226, %v2925_v27 }
0x124a   : > { %4085 = vmatmul.mubr.msk.f32.vlgmr.msra.gmra.mrb[22].mxu0 %vm256_vm0, %v4605_v13 }
0x124b   : > { %4102 = vmatprep.mubr.msk.f32.mxu0 %vm498_vm1, %v2934_v28 }
0x124f   : > { %v4097_v50 = vpop.f32.mrb[32].mxu1 }
0x1250   : > { %v3087_v51 = vpop.f32.mrb[33].mxu1 }
0x1251   : > { %v4317_v52 = vpack.c.bf16 %v4097_v50, %v3087_v51 }
0x1253   : > { %4318 = vmatprep.subr.bf16.mxu1 %v4317_v52 }
0x1254   : > { %4320 = vmatpush3.bf16.msra.mxu1 %v4317_v52 }
0x131d   : > { %v4086_v29 = vpop.f32.mrb[22].mxu0 }
0x131e   : > { %v3007_v30 = vpop.f32.mrb[23].mxu0 }
0x131f   : > { %v4311_v31 = vpack.c.bf16 %v4086_v29, %v3007_v30 }
0x1321   : > { %4313 = vmatprep.subr.msk.bf16.mxu0 %vm4615_vm2, %v4311_v31 }
0x1322   : > { %4316 = vmatpush3.bf16.xpose.msk.msra.mxu0 %vm4615_vm2, %v4311_v31 }
0x1323   : > { %4112 = vmatprep.subr.msk.mxu0 %vm1131_vm4, %v3619_v53 }
0x1329   : > { %4103 = vmatmul.mubr.msk.f32.vlgmr.msra.gmra.mrb[24].mxu0 %vm498_vm1, %v2935_v12 }
0x132a   : > { %4113 = vmatpush3.msk.msra.mxu0 %vm1131_vm4, %v3619_v53 }
0x13fc   : > { %v4104_v37 = vpop.f32.mrb[24].mxu0 }
0x13fd   : > { %v3174_v38 = vpop.f32.mrb[25].mxu0  ;;  %v3186_v39 = vsel %vm586_vm3, %v4104_v37, -inf }
0x13fe   : > { %3187 = vmax.xlane.f32.xlu1 %v3186_v39  ;;  %v3183_v40 = vsel %vm586_vm3, %v3174_v38, -inf }
0x13ff   : > { %3184 = vmax.xlane.f32.xlu0 %v3183_v40 }
0x148b   : > { %v3188_v41 = vpop.xlane.xlu1 %3187 }
0x148c   : > { %v3190_v42 = vsub.f32 %v4104_v37, %v3188_v41  ;;  %v3185_v43 = vpop.xlane.xlu0 %3184 }
0x148d   : > { %v3189_v44 = vsub.f32 %v3174_v38, %v3185_v43 }
0x148e   : > { %v3193_v45 = vmul.f32 1.442695, %v3190_v42 }
0x148f   : > { %v3191_v46 = vmul.f32 1.442695, %v3189_v44 }
0x1490   : > { %4412 = vpow2.f32 %v3193_v45 }
0x1491   : > { %4414 = vpow2.f32 %v3191_v46 }
0x149a   : > { %v4413_v47 = vpop.eup %4412 }
0x149b   : > { %v4415_v48 = vpop.eup %4414  ;;  %v3198_v13 = vsel %vm586_vm3, %v4413_v47, 0.0 }
0x149c   : > { %3199 = vadd.xlane.f32.xlu1 %v3198_v13  ;;  %v3195_v49 = vsel %vm586_vm3, %v4415_v48, 0.0 }
0x149d   : > { %3196 = vadd.xlane.f32.xlu0 %v3195_v49 }
0x1529   : > { %v3200_v54 = vpop.xlane.xlu1 %3199 }
0x152a   : > { %4416 = vrcp.f32 %v3200_v54  ;;  %v3197_v55 = vpop.xlane.xlu0 %3196 }
0x152b   : > { %4418 = vrcp.f32 %v3197_v55 }
0x1534   : > { %v4417_v56 = vpop.eup %4416 }
0x1535   : > { %v4419_v57 = vpop.eup %4418  ;;  %v3204_v59 = vmul.f32 %v4417_v56, %v4413_v47 }
0x1536   : > { %v3203_v58 = vmul.f32 %v4419_v57, %v4415_v48 }
0x1538   : > { %4109 = vmatprep.mubr.msk.f32.mxu1 %vm586_vm3, %v3203_v58 }
0x1539   : > { %4110 = vmatmul.mubr.msk.f32.vlgmr.msra.gmra.mrb[34].mxu1 %vm586_vm3, %v3204_v59 }
0x160c   : > { %v4111_v60 = vpop.f32.mrb[34].mxu1 }
0x160d   : > { %v3277_v61 = vpop.f32.mrb[35].mxu1 }
0x160e   : > { %4114 = vmatprep.mubr.msk.f32.mxu0 %vm498_vm1, %v3277_v61 }
0x160f   : > { %4115 = vmatmul.mubr.msk.f32.vlgmr.msra.gmra.mrb[8].mxu0 %vm498_vm1, %v4111_v60 }
0x16e2   : > { %v4116_v63 = vpop.f32.mrb[8].mxu0 }
0x16e3   : > { %v3382_v0 = vadd.f32 %v4116_v63, %v3623_v62  ;;  %v3363_v1 = vpop.f32.mrb[9].mxu0 }
0x16e4   : > { %v3381_v2 = vadd.f32 %v3623_v62, %v3363_v1 }
0x16e5   : > { %3384 = vst.msk [vmem:[%s244_s9 + $0x8] sm:$0xff] %vm256_vm0, %v3382_v0 }
0x16e6   : > { %3383 = vst.msk [vmem:[%s244_s9] sm:$0xff] %vm256_vm0, %v3381_v2 }
0x16e7   : > { %4433 = shalt.err (!%p4430_p3)
}
0x16e8   : > { %s4434_s19 = scalar_lea.hbm %s5003_s14, 256  ;;  %s4438_s28 = scalar_lea.hbm %s5054_s6, 512 }
0x16e9   : > { %p4435_p4 = scmp.ne.s32.totalorder %s5003_s14, %s4434_s19  ;;  %p4439_p9 = scmp.lt.u32.totalorder %s5003_s14, %s5054_s6 }
0x16ea   : > { %p4440_p10 = scmp.lt.u32.totalorder %s4438_s28, %s4434_s19  ;;  %p4442_p12 = scmp.lt.u32.totalorder %s4434_s19, %s5003_s14 }
0x16eb   : > { %p4436_p7 = pnand %p4435_p4, %p4560_p5 }
0x16ec   : > { %p4441_p11 = por %p4440_p10, %p4439_p9 }
0x16ed   : > { %p4437_p8 = pneg %p4436_p7 }
0x16ee   : > { %p4443_p13 = por %p4442_p12, %p4441_p11 }
0x16f0   : > { %p4444_p0 = pnand %p4443_p13, %p4437_p8 }
0x16f2   : > { %4447 = shalt.err (!%p4444_p0)
}
0x16f3   : > { %s4485_s11 = smov 128   ;;  %s4486_s12 = smov 8  }
0x16f4   : > { %4331 = dma.vmem_to_hbm [thread:$0]  (%p4560_p5), %s4998_s10, 256, %s5003_s14, %s5007_s15, %s4485_s11, %s4485_s11, %s4486_s12  }
0x16f5 PF: > { %p4337_p1 = scmp.ge.s32.totalorder %s4482_s24, 2  ;;  %s3414_s13 = sand.u32 1, %s4470_s21  }
0x16f6   : > { %s3415_s25 = scalar_lea.sflag [#allocation3], %s3414_s13 }
0x16f7   : > { %p4334_p2 = pnand %p4337_p1, %p4564_p6 }
0x16f9   : > { %4465 = dma.done.wait (!%p4334_p2), %s3415_s25, 256  }
0x16fa   : > { %4467 = vsyncadd (!%p4334_p2), %s3415_s25, 4294967040  ;;  %p16_p3 = scmp.ge.s32.totalorder %s4547_s27, 4   ;;  %s5059_s21 = smov %s4474_s22 }
0x16fb   : > { %s5060_s22 = smov %s4478_s23  ;;  %s5061_s23 = smov %s4558_s30 }
0x16fc   : > { %s5062_s24 = smov %s4547_s27  ;;  %18 = sbr.rel (!%p16_p3) target bundleno = 3 (0x3), region = 99 }
0x1703   :  { %3420 = vsyncpa [#allocation3], 1 }
0x1704   :  { %3422 = vsyncpa [#allocation3 + $0x1], 1 }

</bundles_post_ra>
